<compile_context>
chip_gen: v7x
topology: tpu7x:2x2x1
jax: 0.10.0
libtpu: 0.0.40
codegen_flags: <defaults>
</compile_context>

<pallas_src>
import functools
import math

import numpy as np

import jax
import jax.numpy as jnp
from jax import lax
from jax.experimental import pallas as pl
from jax.experimental.pallas import tpu as pltpu


# ----------------------------------------------------------------------------------
# In-kernel channel <-> lane selection patterns (no HBM DMA; iota + bitwise ops only)
# ----------------------------------------------------------------------------------
def _lane_channel(idx, cout):
    # lane-position -> channel index; bitwise AND when Cout is a power of two.
    if cout & (cout - 1) == 0:
        return idx & (cout - 1)
    return idx % cout


def _lane_to_channel_matrix(npad, cout):
    """(Npad, Cout): [l, c] = 1.0 iff l % Cout == c  (folds the Wout copies of a channel)."""
    lane = lax.broadcasted_iota(jnp.int32, (npad, cout), 0)
    ch = lax.broadcasted_iota(jnp.int32, (npad, cout), 1)
    return (_lane_channel(lane, cout) == ch).astype(jnp.float32)


def _channel_to_lane_matrix(npad, cout):
    """(Cout, Npad): [c, l] = 1.0 iff l % Cout == c  (broadcasts per-channel values to lanes)."""
    ch = lax.broadcasted_iota(jnp.int32, (cout, npad), 0)
    lane = lax.broadcasted_iota(jnp.int32, (cout, npad), 1)
    return (_lane_channel(lane, cout) == ch).astype(jnp.float32)


# ----------------------------------------------------------------------------------
# Fused Pallas kernel: valid KxK conv + (train-mode) batch-norm + activation
# ----------------------------------------------------------------------------------
def _conv_block_kernel(x_ref, w_ref, mask_ref, p1_ref, p2_ref, o_ref, *,
                       cout, n_valid, eps, use_bn, activation):
    """One invocation handles the whole batch.

    x_ref   : (M, K*W*Cin)          bf16  K row-shifted windows, concatenated along K
    w_ref   : (K*W*Cin, Npad)       bf16  flattened banded conv weights (Npad = Wout_pad*Cout)
    mask_ref: (1, M)                f32   1.0 for rows whose pixels lie in a single image
    p1_ref  : (1, Cout)             f32   gamma (BN) or conv bias (no BN)
    p2_ref  : (1, Cout)             f32   beta  (BN) or zeros
    o_ref   : (M, Npad)             f32   lane-dense conv-block output
    """
    npad = o_ref.shape[-1]

    # Whole conv = ONE MXU contraction (K = ksize*W*Cin), f32 accumulation.
    acc = jnp.dot(x_ref[...], w_ref[...], preferred_element_type=jnp.float32)

    sel_t = _channel_to_lane_matrix(npad, cout)                     # (Cout, Npad)

    if use_bn:
        # Training-mode BatchNorm2d: biased batch statistics over valid pixels only
        # (cross-image rows are masked; padded lanes hold exact zeros -> contribute 0).
        sel = _lane_to_channel_matrix(npad, cout)                   # (Npad, Cout)
        mask = mask_ref[...]                                        # (1, M)
        s1 = jnp.dot(mask, acc, preferred_element_type=jnp.float32)        # (1, Npad)
        s2 = jnp.dot(mask, acc * acc, preferred_element_type=jnp.float32)  # (1, Npad)
        inv_n = 1.0 / n_valid
        mean = jnp.dot(s1, sel, preferred_element_type=jnp.float32) * inv_n  # (1, Cout)
        ex2 = jnp.dot(s2, sel, preferred_element_type=jnp.float32) * inv_n   # (1, Cout)
        var = ex2 - mean * mean
        scale = p1_ref[...] * lax.rsqrt(var + eps)        # gamma / sqrt(var + eps)
        shift = p2_ref[...] - mean * scale                # beta  - mean * scale
        y = (acc * jnp.dot(scale, sel_t, preferred_element_type=jnp.float32)
             + jnp.dot(shift, sel_t, preferred_element_type=jnp.float32))
    else:
        # No BN -> Conv2d carries a bias.
        y = acc + jnp.dot(p1_ref[...], sel_t, preferred_element_type=jnp.float32)

    if activation == "relu":
        y = jnp.maximum(y, 0.0)
    elif activation == "selu":
        alpha, lam = 1.6732632423543772, 1.0507009873554805
        y = lam * jnp.where(y > 0, y, alpha * (jnp.exp(y) - 1.0))
    o_ref[...] = y.astype(o_ref.dtype)


# ----------------------------------------------------------------------------------
# Wrapper
# ----------------------------------------------------------------------------------
def conv_block_forward(prepared, x_nchw, *, batch_norm=True, activation="relu",
                       eps=1e-3):
    """ConvBlock forward.  x_nchw: (B, Cin, H, W) -> (B, Cout, H-K+1, W-K+1)."""
    wflat = prepared["wflat"]                          # (K*W*Cin, Npad) bf16
    B, Cin, H, W = x_nchw.shape
    Cout = prepared["gamma"].shape[-1]
    ktot, npad = wflat.shape
    ksize = ktot // (W * Cin)
    wout_pad = npad // Cout
    Hout, Wout = H - (ksize - 1), W - (ksize - 1)
    assert ktot == ksize * W * Cin and npad == wout_pad * Cout and wout_pad >= Wout

    M = B * H - (ksize - 1)                            # rows actually computed
    n_valid = float(B * Hout * Wout)                   # pixels entering the BN stats

    # Layout plumbing (cheap XLA glue, done once per call): NCHW -> NHWC, cast ONCE to
    # bf16, row-flatten, then concatenate the K row-shifted windows along the
    # contraction axis so the kernel issues a single K=ksize*W*Cin MXU push.
    x2d = jnp.transpose(x_nchw, (0, 2, 3, 1)).astype(jnp.bfloat16).reshape(B * H, W * Cin)
    xwin = jnp.concatenate([x2d[kh:kh + M] for kh in range(ksize)], axis=1)  # (M, ktot)

    # Compile-time constant: 1.0 for rows whose K input rows lie inside one image.
    rowmask = jnp.asarray(((np.arange(M) % H) < Hout).astype(np.float32).reshape(1, M))

    if batch_norm:
        p1, p2 = prepared["gamma"], prepared["beta"]
    else:
        p1, p2 = prepared["bias"], jnp.zeros_like(prepared["bias"])

    kern = functools.partial(_conv_block_kernel, cout=Cout, n_valid=n_valid, eps=eps,
                             use_bn=batch_norm, activation=activation)

    flops = 2 * M * ktot * npad + (6 * M * npad if batch_norm else 2 * M * npad)
    bytes_accessed = (xwin.size * 2 + wflat.size * 2 + rowmask.size * 4
                      + p1.size * 4 + p2.size * 4 + M * npad * 4)
    transcendentals = M * npad if activation == "selu" else 0

    out2d = pl.pallas_call(
        kern,
        out_shape=jax.ShapeDtypeStruct((M, npad), jnp.float32),
        grid=(1,),
        in_specs=[
            pl.BlockSpec((M, ktot), lambda i: (0, 0)),
            pl.BlockSpec((ktot, npad), lambda i: (0, 0)),
            pl.BlockSpec((1, M), lambda i: (0, 0)),
            pl.BlockSpec((1, Cout), lambda i: (0, 0)),
            pl.BlockSpec((1, Cout), lambda i: (0, 0)),
        ],
        out_specs=pl.BlockSpec((M, npad), lambda i: (0, 0)),
        compiler_params=pltpu.CompilerParams(dimension_semantics=("arbitrary",)),
        cost_estimate=pl.CostEstimate(flops=flops, transcendentals=transcendentals,
                                      bytes_accessed=bytes_accessed),
    )(xwin, wflat, rowmask, p1, p2)

    # Un-flatten: drop the padded lanes, append the (K-1) never-computed tail rows,
    # crop the (K-1) cross-image rows per image, and return NCHW.
    out = out2d.reshape(M, wout_pad, Cout)[:, :Wout]
    out = jnp.pad(out, ((0, ksize - 1), (0, 0), (0, 0)))
    out = out.reshape(B, H, Wout, Cout)[:, :Hout]
    return jnp.transpose(out, (0, 3, 1, 2))


# ----------------------------------------------------------------------------------
# Parameters (torch-layout init) + hoisted kernel-layout preparation
# ----------------------------------------------------------------------------------
def init_conv_block_params(key, in_channels=3, out_channels=32, kernel_size=3):
    k1, k2 = jax.random.split(key)
    fan_in = in_channels * kernel_size * kernel_size
    bound = 1.0 / np.sqrt(fan_in)
    weight = jax.random.uniform(
        k1, (out_channels, in_channels, kernel_size, kernel_size),
        jnp.float32, -bound, bound)                         # torch OIHW layout
    bias = jax.random.uniform(k2, (out_channels,), jnp.float32, -bound, bound)
    gamma = jnp.ones((out_channels,), jnp.float32)          # BatchNorm2d defaults
    beta = jnp.zeros((out_channels,), jnp.float32)
    return {"weight": weight, "bias": bias, "gamma": gamma, "beta": beta}


def prepare_conv_block_params(params, W):
    """Hoisted (one-time) weight prep: flattened banded bf16 matmul slab for width W.

    The output-lane axis is zero-padded from Wout*Cout to the next multiple of 128
    lanes so the kernel's accumulator rows and stores are fully lane-dense.
    """
    weight = np.asarray(params["weight"], np.float32)       # (Cout, Cin, K, K)
    Cout, Cin, K, _ = weight.shape
    Wout = W - (K - 1)
    step = 128 // math.gcd(Cout, 128)
    wout_pad = -(-Wout // step) * step                      # Npad multiple of 128
    w_hwio = np.transpose(weight, (2, 3, 1, 0))             # (K, K, Cin, Cout)
    wflat = np.zeros((K, W, Cin, wout_pad, Cout), np.float32)
    for kh in range(K):
        for kw in range(K):
            for wo in range(Wout):
                wflat[kh, wo + kw, :, wo, :] += w_hwio[kh, kw]
    wflat = wflat.reshape(K * W * Cin, wout_pad * Cout)
    return {
        "wflat": jnp.asarray(wflat, jnp.bfloat16),          # (K*W*Cin, Npad)
        "gamma": params["gamma"].reshape(1, Cout).astype(jnp.float32),
        "beta": params["beta"].reshape(1, Cout).astype(jnp.float32),
        "bias": params["bias"].reshape(1, Cout).astype(jnp.float32),
    }


# ----------------------------------------------------------------------------------
# Pure-JAX reference (mirrors the kernel's bf16 MXU inputs / f32 accumulation)
# ----------------------------------------------------------------------------------
def reference_forward(params, x, *, batch_norm=True, activation="relu", eps=1e-3):
    w = params["weight"].astype(jnp.bfloat16).astype(jnp.float32)
    xb = x.astype(jnp.bfloat16).astype(jnp.float32)
    y = lax.conv_general_dilated(
        xb, w, window_strides=(1, 1), padding="VALID",
        dimension_numbers=("NCHW", "OIHW", "NCHW"),
        precision=lax.Precision.HIGHEST)
    if batch_norm:
        mean = jnp.mean(y, axis=(0, 2, 3), keepdims=True)
        var = jnp.mean(jnp.square(y - mean), axis=(0, 2, 3), keepdims=True)
        y = (y - mean) * lax.rsqrt(var + eps)
        y = y * params["gamma"].reshape(1, -1, 1, 1) + params["beta"].reshape(1, -1, 1, 1)
    else:
        y = y + params["bias"].reshape(1, -1, 1, 1)
    if activation == "relu":
        y = jnp.maximum(y, 0.0)
    else:
        alpha, lam = 1.6732632423543772, 1.0507009873554805
        y = lam * jnp.where(y > 0, y, alpha * (jnp.exp(y) - 1.0))
    return y


# ----------------------------------------------------------------------------------
if __name__ == "__main__":
    key = jax.random.PRNGKey(0)
    kp, kx = jax.random.split(key)

    B, Cin, H, W, Cout = 2, 3, 16, 16, 32        # ConvBlock defaults: 3 -> 32, k=3
    params = init_conv_block_params(kp, in_channels=Cin, out_channels=Cout,
                                    kernel_size=3)
    prepared = prepare_conv_block_params(params, W)
    x = jax.random.normal(kx, (B, Cin, H, W), jnp.float32)   # NCHW, like PyTorch

    fwd = jax.jit(functools.partial(conv_block_forward,
                                    batch_norm=True, activation="relu", eps=1e-3))
    out = jax.block_until_ready(fwd(prepared, x))

    assert out.shape == (B, Cout, H - 2, W - 2), out.shape
    assert bool(jnp.all(jnp.isfinite(out)))

    ref = reference_forward(params, x, batch_norm=True, activation="relu", eps=1e-3)
    np.testing.assert_allclose(np.asarray(out), np.asarray(ref), rtol=3e-2, atol=3e-2)

    print("KERNEL_OK")
</pallas_src>

<mosaic_0001>
module attributes {stable_mosaic.version = 11 : i64} {
  func.func @_conv_block_kernel(%arg0: i32, %arg1: memref<30x144xbf16, #tpu.memory_space<vmem>>, %arg2: memref<144x512xbf16, #tpu.memory_space<vmem>>, %arg3: memref<1x30xf32, #tpu.memory_space<vmem>>, %arg4: memref<1x32xf32, #tpu.memory_space<vmem>>, %arg5: memref<1x32xf32, #tpu.memory_space<vmem>>, %arg6: memref<30x512xf32, #tpu.memory_space<vmem>>) attributes {dimension_semantics = [#tpu.dimension_semantics<arbitrary>], iteration_bounds = array<i64: 1>, scalar_prefetch = 0 : i64, scratch_operands = 0 : i64, tpu.core_type = #tpu.core_type<tc>, window_params = [{pipeline_mode = #tpu.pipeline_mode<synchronous>, transform_indices = @transform_0, window_bounds = array<i64: 30, 144>}, {pipeline_mode = #tpu.pipeline_mode<synchronous>, transform_indices = @transform_1, window_bounds = array<i64: 144, 512>}, {pipeline_mode = #tpu.pipeline_mode<synchronous>, transform_indices = @transform_2, window_bounds = array<i64: 1, 30>}, {pipeline_mode = #tpu.pipeline_mode<synchronous>, transform_indices = @transform_3, window_bounds = array<i64: 1, 32>}, {pipeline_mode = #tpu.pipeline_mode<synchronous>, transform_indices = @transform_4, window_bounds = array<i64: 1, 32>}, {pipeline_mode = #tpu.pipeline_mode<synchronous>, transform_indices = @transform_5, window_bounds = array<i64: 30, 512>}]} {
    %c0 = arith.constant 0 : index
    %c0_0 = arith.constant 0 : index
    %0 = vector.load %arg1[%c0, %c0_0] : memref<30x144xbf16, #tpu.memory_space<vmem>>, vector<30x144xbf16>
    %c0_1 = arith.constant 0 : index
    %c0_2 = arith.constant 0 : index
    %1 = vector.load %arg2[%c0_1, %c0_2] : memref<144x512xbf16, #tpu.memory_space<vmem>>, vector<144x512xbf16>
    %cst = arith.constant dense<0.000000e+00> : vector<30x512xf32>
    %2 = tpu.matmul %0, %1, %cst {dimension_numbers = #tpu.dot_dimension_numbers<[1], [0], [0], [1], [0, 0, 1, 1], [], []>} : vector<30x144xbf16>, vector<144x512xbf16>, vector<30x512xf32> -> vector<30x512xf32>
    %3 = tpu.iota {dimensions = array<i32: 0>} : vector<32x512xi32>
    %4 = tpu.iota {dimensions = array<i32: 1>} : vector<32x512xi32>
    %c31_i32 = arith.constant 31 : i32
    %5 = vector.broadcast %c31_i32 : i32 to vector<32x512xi32>
    %6 = arith.andi %4, %5 : vector<32x512xi32>
    %7 = arith.cmpi eq, %6, %3 : vector<32x512xi32>
    %8 = arith.extui %7 : vector<32x512xi1> to vector<32x512xi32>
    %9 = arith.sitofp %8 : vector<32x512xi32> to vector<32x512xf32>
    %10 = tpu.iota {dimensions = array<i32: 0>} : vector<512x32xi32>
    %11 = tpu.iota {dimensions = array<i32: 1>} : vector<512x32xi32>
    %c31_i32_3 = arith.constant 31 : i32
    %12 = vector.broadcast %c31_i32_3 : i32 to vector<512x32xi32>
    %13 = arith.andi %10, %12 : vector<512x32xi32>
    %14 = arith.cmpi eq, %13, %11 : vector<512x32xi32>
    %15 = arith.extui %14 : vector<512x32xi1> to vector<512x32xi32>
    %16 = arith.sitofp %15 : vector<512x32xi32> to vector<512x32xf32>
    %c0_4 = arith.constant 0 : index
    %c0_5 = arith.constant 0 : index
    %17 = vector.load %arg3[%c0_4, %c0_5] : memref<1x30xf32, #tpu.memory_space<vmem>>, vector<1x30xf32>
    %cst_6 = arith.constant dense<0.000000e+00> : vector<1x512xf32>
    %18 = tpu.matmul %17, %2, %cst_6 {dimension_numbers = #tpu.dot_dimension_numbers<[1], [0], [0], [1], [0, 0, 1, 1], [], []>} : vector<1x30xf32>, vector<30x512xf32>, vector<1x512xf32> -> vector<1x512xf32>
    %19 = arith.mulf %2, %2 : vector<30x512xf32>
    %cst_7 = arith.constant dense<0.000000e+00> : vector<1x512xf32>
    %20 = tpu.matmul %17, %19, %cst_7 {dimension_numbers = #tpu.dot_dimension_numbers<[1], [0], [0], [1], [0, 0, 1, 1], [], []>} : vector<1x30xf32>, vector<30x512xf32>, vector<1x512xf32> -> vector<1x512xf32>
    %cst_8 = arith.constant dense<0.000000e+00> : vector<1x32xf32>
    %21 = tpu.matmul %18, %16, %cst_8 {dimension_numbers = #tpu.dot_dimension_numbers<[1], [0], [0], [1], [0, 0, 1, 1], [], []>} : vector<1x512xf32>, vector<512x32xf32>, vector<1x32xf32> -> vector<1x32xf32>
    %cst_9 = arith.constant 0.00255102036 : f32
    %22 = vector.broadcast %cst_9 : f32 to vector<1x32xf32>
    %23 = arith.mulf %21, %22 : vector<1x32xf32>
    %cst_10 = arith.constant dense<0.000000e+00> : vector<1x32xf32>
    %24 = tpu.matmul %20, %16, %cst_10 {dimension_numbers = #tpu.dot_dimension_numbers<[1], [0], [0], [1], [0, 0, 1, 1], [], []>} : vector<1x512xf32>, vector<512x32xf32>, vector<1x32xf32> -> vector<1x32xf32>
    %cst_11 = arith.constant 0.00255102036 : f32
    %25 = vector.broadcast %cst_11 : f32 to vector<1x32xf32>
    %26 = arith.mulf %24, %25 : vector<1x32xf32>
    %27 = arith.mulf %23, %23 : vector<1x32xf32>
    %28 = arith.subf %26, %27 : vector<1x32xf32>
    %c0_12 = arith.constant 0 : index
    %c0_13 = arith.constant 0 : index
    %29 = vector.load %arg4[%c0_12, %c0_13] : memref<1x32xf32, #tpu.memory_space<vmem>>, vector<1x32xf32>
    %cst_14 = arith.constant 1.000000e-03 : f32
    %30 = vector.broadcast %cst_14 : f32 to vector<1x32xf32>
    %31 = arith.addf %28, %30 : vector<1x32xf32>
    %32 = math.rsqrt %31 : vector<1x32xf32>
    %33 = arith.mulf %29, %32 : vector<1x32xf32>
    %c0_15 = arith.constant 0 : index
    %c0_16 = arith.constant 0 : index
    %34 = vector.load %arg5[%c0_15, %c0_16] : memref<1x32xf32, #tpu.memory_space<vmem>>, vector<1x32xf32>
    %35 = arith.mulf %23, %33 : vector<1x32xf32>
    %36 = arith.subf %34, %35 : vector<1x32xf32>
    %cst_17 = arith.constant dense<0.000000e+00> : vector<1x512xf32>
    %37 = tpu.matmul %33, %9, %cst_17 {dimension_numbers = #tpu.dot_dimension_numbers<[1], [0], [0], [1], [0, 0, 1, 1], [], []>} : vector<1x32xf32>, vector<32x512xf32>, vector<1x512xf32> -> vector<1x512xf32>
    %38 = vector.broadcast %37 : vector<1x512xf32> to vector<30x512xf32>
    %39 = arith.mulf %2, %38 : vector<30x512xf32>
    %cst_18 = arith.constant dense<0.000000e+00> : vector<1x512xf32>
    %40 = tpu.matmul %36, %9, %cst_18 {dimension_numbers = #tpu.dot_dimension_numbers<[1], [0], [0], [1], [0, 0, 1, 1], [], []>} : vector<1x32xf32>, vector<32x512xf32>, vector<1x512xf32> -> vector<1x512xf32>
    %41 = vector.broadcast %40 : vector<1x512xf32> to vector<30x512xf32>
    %42 = arith.addf %39, %41 : vector<30x512xf32>
    %cst_19 = arith.constant 0.000000e+00 : f32
    %43 = vector.broadcast %cst_19 : f32 to vector<30x512xf32>
    %44 = arith.maximumf %42, %43 : vector<30x512xf32>
    %c0_20 = arith.constant 0 : index
    %c0_21 = arith.constant 0 : index
    %45 = vector.load %arg6[%c0_20, %c0_21] : memref<30x512xf32, #tpu.memory_space<vmem>>, vector<30x512xf32>
    tpu.vector_store %arg6[%c0_20, %c0_21], %44 {strides = array<i32>} : memref<30x512xf32, #tpu.memory_space<vmem>>, vector<30x512xf32>,
    return
  }
  func.func @transform_0(%arg0: i32) -> (i32, i32) {
    %c0_i32 = arith.constant 0 : i32
    %c0_i32_0 = arith.constant 0 : i32
    %c0_i32_1 = arith.constant 0 : i32
    return %c0_i32, %c0_i32_0 : i32, i32
  }
  func.func @transform_1(%arg0: i32) -> (i32, i32) {
    %c0_i32 = arith.constant 0 : i32
    %c0_i32_0 = arith.constant 0 : i32
    %c0_i32_1 = arith.constant 0 : i32
    return %c0_i32, %c0_i32_0 : i32, i32
  }
  func.func @transform_2(%arg0: i32) -> (i32, i32) {
    %c0_i32 = arith.constant 0 : i32
    %c0_i32_0 = arith.constant 0 : i32
    %c0_i32_1 = arith.constant 0 : i32
    return %c0_i32, %c0_i32_0 : i32, i32
  }
  func.func @transform_3(%arg0: i32) -> (i32, i32) {
    %c0_i32 = arith.constant 0 : i32
    %c0_i32_0 = arith.constant 0 : i32
    %c0_i32_1 = arith.constant 0 : i32
    return %c0_i32, %c0_i32_0 : i32, i32
  }
  func.func @transform_4(%arg0: i32) -> (i32, i32) {
    %c0_i32 = arith.constant 0 : i32
    %c0_i32_0 = arith.constant 0 : i32
    %c0_i32_1 = arith.constant 0 : i32
    return %c0_i32, %c0_i32_0 : i32, i32
  }
  func.func @transform_5(%arg0: i32) -> (i32, i32) {
    %c0_i32 = arith.constant 0 : i32
    %c0_i32_0 = arith.constant 0 : i32
    %c0_i32_1 = arith.constant 0 : i32
    return %c0_i32, %c0_i32_0 : i32, i32
  }
}

</mosaic_0001>

<bundles_post_ra>
// kernel: conv_block_forward.1
= control target key start
LH: loop header
LB: loop body
LE: loop exit
PB: predicated region body
PF: predicated region fallthrough
CT: control target
= control target key end

     0   :  { %vm259_vm0 = vcmask 130048   ;;  %v3982_v40 = vmov 0.0   ;;  %v372_v41 = vlaneseq  ;;  %vm755_vm1 = vcmask 1045504   ;;  %s3976_s1 = inlined_call_operand.vmem [shape: bf16[144,512], index: 1, kind: input, shape index: {}]   ;;  %s3977_s0 = inlined_call_operand.vmem [shape: bf16[30,144], index: 0, kind: input, shape index: {}]   ;;  %s3978_s2 = inlined_call_operand.vmem [shape: f32[1,30], index: 2, kind: input, shape index: {}]   ;;  %s3979_s3 = inlined_call_operand.vmem [shape: f32[1,32], index: 3, kind: input, shape index: {}]   ;;  %s3980_s4 = inlined_call_operand.vmem [shape: f32[1,32], index: 4, kind: input, shape index: {}]   ;;  %s3981_s5 = inlined_call_operand.vmem [shape: f32[30,512], index: 5, kind: output, shape index: {}]  }
   0x1   :  { %v2405_v0 = vld [vmem:[%s3976_s1 + $0x4] ss:$16 sps:$4 sm:$0xff]   ;;  %v2407_v1 = vld [vmem:[%s3976_s1 + $0xc] ss:$16 sps:$4 sm:$0xff]   ;;  %v2409_v2 = vld [vmem:[%s3976_s1] ss:$16 sps:$4 sm:$0xff]  }
   0x2   :  { %266 = vmatprep.subr.bf16.mxu0 %v2405_v0  ;;  %v2410_v3 = vld [vmem:[%s3976_s1 + $0x8] ss:$16 sps:$4 sm:$0xff]   ;;  %319 = vmatprep.subr.bf16.mxu1 %v2407_v1  ;;  %v2411_v4 = vld [vmem:[%s3976_s1 + $0x24] ss:$16 sps:$4 sm:$0xff]   ;;  %v2413_v5 = vld [vmem:[%s3976_s1 + $0x2c] ss:$16 sps:$4 sm:$0xff]  }
   0x3   :  { %267 = vmatpush1.bf16.msra.mxu0 %v2409_v2  ;;  %320 = vmatpush1.bf16.msra.mxu1 %v2410_v3  ;;  %v2415_v6 = vld [vmem:[%s3976_s1 + $0x20] ss:$16 sps:$4 sm:$0xff]   ;;  %v2416_v7 = vld [vmem:[%s3976_s1 + $0x28] ss:$16 sps:$4 sm:$0xff]   ;;  %v2417_v8 = vld [vmem:[%s3976_s1 + $0x44] ss:$16 sps:$4 sm:$0xff]  }
   0x4   :  { %268 = vmatprep.subr.bf16.mxu0 %v2411_v4  ;;  %321 = vmatprep.subr.bf16.mxu1 %v2413_v5  ;;  %v2419_v9 = vld [vmem:[%s3976_s1 + $0x4c] ss:$16 sps:$4 sm:$0xff]   ;;  %v2421_v10 = vld [vmem:[%s3976_s1 + $0x40] ss:$16 sps:$4 sm:$0xff]   ;;  %v2422_v11 = vld [vmem:[%s3976_s1 + $0x48] ss:$16 sps:$4 sm:$0xff]  }
   0x5   :  { %v2423_v12 = vld [vmem:[%s3976_s1 + $0x64] ss:$16 sps:$4 sm:$0xff]   ;;  %v2425_v13 = vld [vmem:[%s3976_s1 + $0x6c] ss:$16 sps:$4 sm:$0xff]   ;;  %v2427_v14 = vld [vmem:[%s3976_s1 + $0x60] ss:$16 sps:$4 sm:$0xff]  }
   0x6   :  { %v2428_v15 = vld [vmem:[%s3976_s1 + $0x68] ss:$16 sps:$4 sm:$0xff]   ;;  %v2429_v16 = vld [vmem:[%s3976_s1 + $0x84] ss:$16 sps:$4 sm:$0xff]   ;;  %v2431_v17 = vld [vmem:[%s3976_s1 + $0x8c] ss:$16 sps:$4 sm:$0xff]  }
   0x7   :  { %269 = vmatpush1.bf16.msra.mxu0 %v2415_v6  ;;  %322 = vmatpush1.bf16.msra.mxu1 %v2416_v7  ;;  %v2433_v18 = vld [vmem:[%s3976_s1 + $0x80] ss:$16 sps:$4 sm:$0xff]   ;;  %v2434_v19 = vld [vmem:[%s3976_s1 + $0x88] ss:$16 sps:$4 sm:$0xff]   ;;  %v2435_v20 = vld [vmem:[%s3976_s1 + $0xa4] ss:$16 sps:$4 sm:$0xff]  }
   0x8   :  { %270 = vmatprep.subr.bf16.mxu0 %v2417_v8  ;;  %323 = vmatprep.subr.bf16.mxu1 %v2419_v9  ;;  %v2437_v21 = vld [vmem:[%s3976_s1 + $0xac] ss:$16 sps:$4 sm:$0xff]   ;;  %v2439_v22 = vld [vmem:[%s3976_s1 + $0xa0] ss:$16 sps:$4 sm:$0xff]   ;;  %v2440_v23 = vld [vmem:[%s3976_s1 + $0xa8] ss:$16 sps:$4 sm:$0xff]  }
   0x9   :  { %v2441_v24 = vld [vmem:[%s3976_s1 + $0xc4] ss:$16 sps:$4 sm:$0xff]   ;;  %v2443_v25 = vld [vmem:[%s3976_s1 + $0xcc] ss:$16 sps:$4 sm:$0xff]   ;;  %v2445_v26 = vld [vmem:[%s3976_s1 + $0xc0] ss:$16 sps:$4 sm:$0xff]  }
   0xa   :  { %v2446_v27 = vld [vmem:[%s3976_s1 + $0xc8] ss:$16 sps:$4 sm:$0xff]   ;;  %v2447_v28 = vld [vmem:[%s3976_s1 + $0xe4] ss:$16 sps:$4 sm:$0xff]   ;;  %v2449_v29 = vld [vmem:[%s3976_s1 + $0xec] ss:$16 sps:$4 sm:$0xff]  }
   0xb   :  { %271 = vmatpush1.bf16.msra.mxu0 %v2421_v10  ;;  %324 = vmatpush1.bf16.msra.mxu1 %v2422_v11  ;;  %v2461_v30 = vld [vmem:[%s3977_s0 + $0x4] ss:$8 sps:$4 sm:$0xff]   ;;  %v2451_v31 = vld [vmem:[%s3976_s1 + $0xe0] ss:$16 sps:$4 sm:$0xff]   ;;  %v2452_v32 = vld [vmem:[%s3976_s1 + $0xe8] ss:$16 sps:$4 sm:$0xff]  }
   0xc   :  { %272 = vmatprep.subr.bf16.mxu0 %v2423_v12  ;;  %325 = vmatprep.subr.bf16.mxu1 %v2425_v13  ;;  %v2453_v33 = vld [vmem:[%s3976_s1 + $0x104] ss:$16 sps:$4 sm:$0xff]   ;;  %v2455_v34 = vld [vmem:[%s3976_s1 + $0x10c] ss:$16 sps:$4 sm:$0xff]   ;;  %v2457_v35 = vld [vmem:[%s3976_s1 + $0x100] ss:$16 sps:$4 sm:$0xff]  }
   0xd   :  { %1802 = vmatprep.mubr.msk.bf16.mxu0 %vm259_vm0, %v2461_v30  ;;  %1804 = vmatprep.mubr.msk.bf16.mxu1 %vm259_vm0, %v2461_v30  ;;  %v2458_v36 = vld [vmem:[%s3976_s1 + $0x108] ss:$16 sps:$4 sm:$0xff]   ;;  %v2462_v38 = vld [vmem:[%s3977_s0 + $0x14] ss:$8 sps:$4 sm:$0x7f]   ;;  %v2626_v42 = vshrl.u32 %v372_v41, 7 }
   0xe   :  { %v2459_v37 = vld [vmem:[%s3977_s0] ss:$8 sps:$4 sm:$0xff]   ;;  %v2464_v39 = vld [vmem:[%s3977_s0 + $0x10] ss:$8 sps:$4 sm:$0x7f]   ;;  %v2652_v51 = vand.u32 127, %v372_v41 }
   0xf   :  { %273 = vmatpush1.bf16.msra.mxu0 %v2427_v14  ;;  %326 = vmatpush1.bf16.msra.mxu1 %v2428_v15  ;;  %4124 = vst [vmem:[#allocation2_spill] sm:$0xff] %v2626_v42  ;;  %v2629_v43 = vadd.s32 128, %v2626_v42  ;;  %v2632_v44 = vadd.s32 136, %v2626_v42  ;;  %v2635_v45 = vadd.s32 384, %v2626_v42  ;;  %v2638_v46 = vadd.s32 392, %v2626_v42 }
  0x10   :  { %274 = vmatprep.subr.bf16.mxu0 %v2429_v16  ;;  %327 = vmatprep.subr.bf16.mxu1 %v2431_v17  ;;  %v2641_v47 = vadd.s32 8, %v2626_v42  ;;  %v2644_v48 = vadd.s32 256, %v2626_v42  ;;  %v2647_v49 = vadd.s32 264, %v2626_v42  ;;  %v2650_v50 = vadd.s32 144, %v2626_v42 }
  0x11   :  { %v494_v52 = vand.u32 31, %v2626_v42  ;;  %v2656_v53 = vadd.s32 152, %v2626_v42  ;;  %v510_v54 = vand.u32 31, %v2629_v43  ;;  %v511_v55 = vand.u32 31, %v2632_v44 }
  0x12   :  { %4125 = vst [vmem:[#allocation3_spill] sm:$0xff] %v2641_v47  ;;  %v542_v56 = vand.u32 31, %v2635_v45  ;;  %v543_v57 = vand.u32 31, %v2638_v46  ;;  %v495_v58 = vand.u32 31, %v2641_v47  ;;  %v2666_v61 = vadd.s32 400, %v2626_v42 }
  0x13   :  { %275 = vmatpush1.bf16.msra.mxu0 %v2433_v18  ;;  %328 = vmatpush1.bf16.msra.mxu1 %v2434_v19  ;;  %v2674_v1 = vadd.s32 408, %v2626_v42  ;;  %v2677_v2 = vadd.s32 16, %v2626_v42  ;;  %v2680_v3 = vadd.s32 24, %v2626_v42  ;;  %v2688_v7 = vadd.s32 272, %v2626_v42 }
  0x14   :  { %276 = vmatprep.subr.bf16.mxu0 %v2435_v20  ;;  %329 = vmatprep.subr.bf16.mxu1 %v2437_v21  ;;  %v2691_v8 = vadd.s32 280, %v2626_v42  ;;  %v2694_v9 = vadd.s32 160, %v2626_v42  ;;  %v2770_v43 = vadd.s32 424, %v2626_v42  ;;  %v2773_v44 = vadd.s32 32, %v2626_v42 }
  0x15   :  { %4128 = vst [vmem:[#allocation6_spill] sm:$0xff] %v2677_v2  ;;  %4129 = vst [vmem:[#allocation7_spill] sm:$0xff] %v2680_v3  ;;  %vm2783_vm3 = vcmp.eq.s32.totalorder %v510_v54, %v2652_v51  ;;  %vm2788_vm4 = vcmp.eq.s32.totalorder %v511_v55, %v2652_v51  ;;  %vm2823_vm5 = vcmp.eq.s32.totalorder %v542_v56, %v2652_v51  ;;  %vm2468_vm7 = vmmov 1  }
  0x16   :  { %vm2830_vm6 = vcmp.eq.s32.totalorder %v543_v57, %v2652_v51  ;;  %vm2851_vm8 = vmpackc.low %vm755_vm1, %vm2468_vm7  ;;  %vm2858_vm9 = vcmp.eq.s32.totalorder %v494_v52, %v2652_v51  ;;  %v4154_v60 = vmov 0  ;;  %vm2865_vm10 = vcmp.eq.s32.totalorder %v495_v58, %v2652_v51 }
  0x17   :  { %277 = vmatpush1.bf16.msra.mxu0 %v2439_v22  ;;  %330 = vmatpush1.bf16.msra.mxu1 %v2440_v23  ;;  %v4155_v60 = vsel %vm2858_vm9, 4294967295, %v4154_v60  ;;  %v4156_v59 = vmov 0  ;;  %v4159_v58 = vmov 0  ;;  %v4307_v47 = vmov 0 }
  0x18   :  { %278 = vmatprep.subr.bf16.mxu0 %v2441_v24  ;;  %331 = vmatprep.subr.bf16.mxu1 %v2443_v25  ;;  %v4157_v59 = vsel %vm2865_vm10, 4294967295, %v4156_v59 }
  0x1b   :  { %279 = vmatpush1.bf16.msra.mxu0 %v2445_v26  ;;  %332 = vmatpush1.bf16.msra.mxu1 %v2446_v27  ;;  %v2795_v27 = vadd.s32 288, %v2626_v42  ;;  %v2798_v26 = vadd.s32 296, %v2626_v42 }
  0x1c   :  { %280 = vmatprep.subr.bf16.mxu0 %v2447_v28  ;;  %333 = vmatprep.subr.bf16.mxu1 %v2449_v29  ;;  %v2749_v28 = vadd.s32 168, %v2626_v42  ;;  %v2752_v29 = vadd.s32 416, %v2626_v42 }
  0x1f   :  { %281 = vmatpush1.bf16.msra.mxu0 %v2451_v31  ;;  %334 = vmatpush1.bf16.msra.mxu1 %v2452_v32  ;;  %v544_v32 = vand.u32 31, %v2666_v61  ;;  %v2776_v61 = vadd.s32 40, %v2626_v42  ;;  %v4148_v31 = vmov 0 }
  0x20   :  { %282 = vmatprep.subr.bf16.mxu0 %v2453_v33  ;;  %335 = vmatprep.subr.bf16.mxu1 %v2455_v34  ;;  %v545_v33 = vand.u32 31, %v2674_v1  ;;  %v496_v34 = vand.u32 31, %v2677_v2  ;;  %v4149_v31 = vsel %vm2830_vm6, 4294967295, %v4148_v31  ;;  %v475_v2 = vadd.s32 360, %v2626_v42 }
  0x21   :  { %vm2918_vm15 = vcmp.eq.s32.totalorder %v544_v32, %v2652_v51  ;;  %v4176_v32 = vmov 0 }
  0x22   :  { %vm2939_vm1 = vcmp.eq.s32.totalorder %v496_v34, %v2652_v51 }
  0x23   :  { %283 = vmatpush1.bf16.msra.mxu0 %v2457_v35  ;;  %336 = vmatpush1.bf16.msra.mxu1 %v2458_v36  ;;  %v497_v35 = vand.u32 31, %v2680_v3  ;;  %v4146_v36 = vmov 0 }
  0x24   :  { %v4147_v36 = vsel %vm2823_vm5, 4294967295, %v4146_v36 }
  0x25   :  { %vm2944_vm7 = vcmp.eq.s32.totalorder %v497_v35, %v2652_v51  ;;  %v4180_v35 = vand.u32 31, %v2688_v7  ;;  %v4186_v7 = vand.u32 31, %v2694_v9  ;;  %v4192_v9 = vmov 0 }
  0x26   :  { %299 = vmatmul.mubr.bf16.vlgmr.msra.gmra.mrb[0].mxu0 %v2459_v37  ;;  %352 = vmatmul.mubr.bf16.vlgmr.msra.gmra.mrb[0].mxu1 %v2459_v37  ;;  %v4177_v32 = vsel %vm2944_vm7, 4294967295, %v4176_v32 }
  0x27   :  { %1803 = vmatprep.mubr.msk.bf16.mxu0 %vm259_vm0, %v2462_v38  ;;  %1805 = vmatprep.mubr.msk.bf16.mxu1 %vm259_vm0, %v2462_v38  ;;  %vm2923_vm0 = vcmp.eq.s32.totalorder %v545_v33, %v2652_v51  ;;  %v498_v33 = vand.u32 31, %v2773_v44  ;;  %vm2960_vm2 = vcmp.eq.s32.totalorder %v4180_v35, %v2652_v51  ;;  %v4184_v44 = vmov 0 }
  0x2e   :  { %309 = vmatmul.mubr.bf16.gmra.mrb[4].mxu0 %v2464_v39  ;;  %362 = vmatmul.mubr.bf16.gmra.mrb[4].mxu1 %v2464_v39 }
  0x2f   :  { %832 = vmatprep.mubr.f32.mxu0 %v3982_v40  ;;  %903 = vmatprep.mubr.f32.mxu1 %v3982_v40 }
  0xf9   :  { %v2668_v62 = vpop.f32.mrb[0].mxu0  ;;  %v2670_v63 = vpop.f32.mrb[0].mxu1 }
  0xfa   :  { %4126 = vst [vmem:[#allocation4_spill] sm:$0xff] %v2668_v62  ;;  %4127 = vst [vmem:[#allocation5_spill] sm:$0xff] %v2670_v63  ;;  %v2682_v4 = vpop.f32.mrb[1].mxu0  ;;  %v2684_v5 = vpop.f32.mrb[1].mxu1  ;;  %v2698_v10 = vmul.f32 %v2668_v62, %v2668_v62  ;;  %v2702_v11 = vmul.f32 %v2670_v63, %v2670_v63 }
  0xfb   :  { %4130 = vst [vmem:[#allocation8_spill] sm:$0xff] %v2682_v4  ;;  %4131 = vst [vmem:[#allocation9_spill] sm:$0xff] %v2684_v5  ;;  %v2706_v12 = vmul.f32 %v2682_v4, %v2682_v4  ;;  %v2710_v13 = vmul.f32 %v2684_v5, %v2684_v5  ;;  %v2712_v14 = vpop.f32.mrb[2].mxu0  ;;  %v2714_v15 = vpop.f32.mrb[2].mxu1 }
  0xfc   :  { %4132 = vst [vmem:[#allocation10_spill] sm:$0xff] %v2712_v14  ;;  %4133 = vst [vmem:[#allocation11_spill] sm:$0xff] %v2714_v15  ;;  %v2204_v16 = vpack.c.bf16 %v2712_v14, %v2668_v62  ;;  %v2720_v17 = vmul.f32 %v2712_v14, %v2712_v14  ;;  %v2214_v18 = vpack.c.bf16 %v2714_v15, %v2670_v63  ;;  %v2728_v20 = vpop.f32.mrb[3].mxu0  ;;  %v2730_v21 = vpop.f32.mrb[3].mxu1  ;;  %v459_v63 = vadd.s32 232, %v2626_v42 }
  0xfd   :  { %v2726_v19 = vmul.f32 %v2714_v15, %v2714_v15  ;;  %4134 = vst [vmem:[#allocation12_spill] sm:$0xff] %v2728_v20  ;;  %4135 = vst [vmem:[#allocation13_spill] sm:$0xff] %v2730_v21  ;;  %v2202_v22 = vpack.c.bf16 %v2728_v20, %v2682_v4  ;;  %v2736_v23 = vmul.f32 %v2728_v20, %v2728_v20  ;;  %v4158_v4 = vand.u32 31, %v2644_v48 }
  0xfe   :  { %v2212_v24 = vpack.c.bf16 %v2730_v21, %v2684_v5  ;;  %v2742_v25 = vmul.f32 %v2730_v21, %v2730_v21  ;;  %v4164_v48 = vand.u32 31, %v2650_v50  ;;  %v4170_v50 = vmov 0 }
  0xff   :  { %2203 = vmatprep.subr.bf16.mxu0 %v2202_v22  ;;  %v4142_v22 = vmov 0  ;;  %vm2880_vm11 = vcmp.eq.s32.totalorder %v4158_v4, %v2652_v51  ;;  %v4165_v4 = vmov 0  ;;  %v4171_v50 = vsel %vm2918_vm15, 4294967295, %v4170_v50 }
 0x100   :  { %2213 = vmatprep.subr.bf16.mxu1 %v2212_v24  ;;  %2205 = vmatpush1.bf16.msra.mxu0 %v2204_v16  ;;  %v4143_v22 = vsel %vm2788_vm4, 4294967295, %v4142_v22  ;;  %v4160_v58 = vsel %vm2880_vm11, 4294967295, %v4159_v58  ;;  %vm2898_vm13 = vcmp.eq.s32.totalorder %v4164_v48, %v2652_v51  ;;  %v4179_v34 = vpack.c.bf16 %v2742_v25, %v2710_v13 }
 0x101   :  { %2215 = vmatpush1.bf16.msra.mxu1 %v2214_v18  ;;  %v2764_v38 = vpop.f32.mrb[4].mxu0  ;;  %v2766_v39 = vpop.f32.mrb[4].mxu1  ;;  %v4140_v18 = vmov 0  ;;  %v4166_v4 = vsel %vm2898_vm13, 4294967295, %v4165_v4  ;;  %v436_v13 = vadd.s32 48, %v2626_v42  ;;  %v437_v25 = vadd.s32 56, %v2626_v42 }
 0x102   :  { %4136 = vst [vmem:[#allocation14_spill] sm:$0xff] %v2764_v38  ;;  %4137 = vst [vmem:[#allocation15_spill] sm:$0xff] %v2766_v39  ;;  %v2778_v1 = vpop.f32.mrb[5].mxu0  ;;  %v2780_v16 = vpop.f32.mrb[5].mxu1  ;;  %v4141_v18 = vsel %vm2783_vm3, 4294967295, %v4140_v18  ;;  %v2802_v54 = vmul.f32 %v2764_v38, %v2764_v38  ;;  %v2806_v55 = vmul.f32 %v2766_v39, %v2766_v39  ;;  %v4197_v35 = vpack.c.bf16 %v2720_v17, %v2698_v10 }
 0x103   :  { %4138 = vst [vmem:[#allocation16_spill] sm:$0xff] %v2778_v1  ;;  %4139 = vst [vmem:[#allocation17_spill] sm:$0xff] %v2780_v16  ;;  %v2810_v41 = vmul.f32 %v2778_v1, %v2778_v1  ;;  %v2814_v40 = vmul.f32 %v2780_v16, %v2780_v16  ;;  %v2816_v24 = vpop.f32.mrb[6].mxu0  ;;  %v2818_v37 = vpop.f32.mrb[6].mxu1  ;;  %v454_v10 = vadd.s32 192, %v2626_v42  ;;  %v4207_v17 = vmov 0 }
 0x104   :  { %4144 = vst [vmem:[#allocation18_spill] sm:$0xff] %v2816_v24  ;;  %4145 = vst [vmem:[#allocation19_spill] sm:$0xff] %v2818_v37  ;;  %v2209_v30 = vpack.c.bf16 %v2816_v24, %v2764_v38  ;;  %v2838_v6 = vmul.f32 %v2816_v24, %v2816_v24  ;;  %v2219_v45 = vpack.c.bf16 %v2818_v37, %v2766_v39  ;;  %v2846_v0 = vpop.f32.mrb[7].mxu0  ;;  %v2848_v46 = vpop.f32.mrb[7].mxu1  ;;  %v4263_v15 = vmov 1.0|1.0  }
 0x105   :  { %v2844_v56 = vmul.f32 %v2818_v37, %v2818_v37  ;;  %4150 = vst [vmem:[#allocation20_spill] sm:$0xff] %v2846_v0  ;;  %4151 = vst [vmem:[#allocation21_spill] sm:$0xff] %v2848_v46  ;;  %v2206_v21 = vpack.c.bf16 %v2846_v0, %v2778_v1  ;;  %v923_v5 = vmul.f32 %v2846_v0, %v2846_v0  ;;  %v4161_v37 = vand.u32 31, %v2647_v49 }
 0x106   :  { %v2216_v20 = vpack.c.bf16 %v2848_v46, %v2780_v16  ;;  %v925_v52 = vmul.f32 %v2848_v46, %v2848_v46  ;;  %v4162_v1 = vmov 0  ;;  %v4167_v49 = vand.u32 31, %v2656_v53 }
 0x107   :  { %vm2887_vm12 = vcmp.eq.s32.totalorder %v4161_v37, %v2652_v51  ;;  %v4168_v37 = vmov 0  ;;  %v452_v0 = vadd.s32 176, %v2626_v42  ;;  %v453_v16 = vadd.s32 184, %v2626_v42  ;;  %2208 = vmatprep.subr.msk.bf16.mxu0 %vm2851_vm8, %v2206_v21 }
 0x108   :  { %v4163_v1 = vsel %vm2887_vm12, 4294967295, %v4162_v1  ;;  %vm2905_vm14 = vcmp.eq.s32.totalorder %v4167_v49, %v2652_v51  ;;  %v2226_v46 = vpack.c.bf16 %v923_v5, %v2810_v41  ;;  %v2236_v39 = vpack.c.bf16 %v925_v52, %v2814_v40  ;;  %2218 = vmatprep.subr.msk.bf16.mxu1 %vm2851_vm8, %v2216_v20  ;;  %2211 = vmatpush1.bf16.msk.msra.mxu0 %vm2851_vm8, %v2209_v30  ;;  %v2936_v20 = vld [vmem:[%s3978_s2] sm:$0x1] }
 0x109   :  { %v4169_v37 = vsel %vm2905_vm14, 4294967295, %v4168_v37  ;;  %v4172_v53 = vmov 0  ;;  %v484_v5 = vadd.s32 432, %v2626_v42  ;;  %v485_v40 = vadd.s32 440, %v2626_v42  ;;  %2221 = vmatpush1.bf16.msk.msra.mxu1 %vm2851_vm8, %v2219_v45 }
 0x10a   :  { %v4173_v53 = vsel %vm2923_vm0, 4294967295, %v4172_v53  ;;  %v4174_v21 = vmov 0  ;;  %v547_v30 = vand.u32 31, %v2770_v43  ;;  %v499_v41 = vand.u32 31, %v2776_v61  ;;  %2233 = vmatprep.subr.bf16.mxu1 %v4179_v34 }
 0x10b   :  { %v4175_v21 = vsel %vm2939_vm1, 4294967295, %v4174_v21  ;;  %v4178_v45 = vpack.c.bf16 %v2736_v23, %v2706_v12  ;;  %v4181_v52 = vmov 0  ;;  %v4183_v43 = vand.u32 31, %v2691_v8 }
 0x10c   :  { %v4182_v52 = vsel %vm2960_vm2, 4294967295, %v4181_v52  ;;  %v530_v12 = vand.u32 31, %v2795_v27  ;;  %v531_v23 = vand.u32 31, %v2798_v26  ;;  %vm2978_vm1 = vcmp.eq.s32.totalorder %v4186_v7, %v2652_v51 }
 0x10d   :  { %2223 = vmatprep.subr.bf16.mxu0 %v4178_v45  ;;  %vm2967_vm7 = vcmp.eq.s32.totalorder %v4183_v43, %v2652_v51  ;;  %v4187_v61 = vmov 0  ;;  %v516_v8 = vand.u32 31, %v452_v0  ;;  %v517_v48 = vand.u32 31, %v453_v16 }
 0x10e   :  { %v4185_v44 = vsel %vm2967_vm7, 4294967295, %v4184_v44  ;;  %v4188_v61 = vsel %vm2978_vm1, 4294967295, %v4187_v61  ;;  %v468_v49 = vadd.s32 304, %v2626_v42  ;;  %v469_v45 = vadd.s32 312, %v2626_v42 }
 0x10f   :  { %vm4189_vm7 = vcmask 244736   ;;  %v4191_v26 = vand.u32 31, %v2749_v28  ;;  %v4194_v0 = vand.u32 31, %v2752_v29  ;;  %v4195_v27 = vmov 0 }
 0x110   :  { %1888 = vmatmul.mubr.msk.f32.vlgmr.msra.gmra.mrb[8].mxu0 %vm4189_vm7, %v2936_v20  ;;  %vm4190_vm2 = vmmov %vm4189_vm7  ;;  %v548_v16 = vand.u32 31, %v484_v5  ;;  %v549_v34 = vand.u32 31, %v485_v40  ;;  %v4198_v28 = vpack.c.bf16 %v2726_v19, %v2702_v11  ;;  %v4199_v43 = vmov 0 }
 0x111   :  { %1891 = vmatmul.mubr.msk.f32.vlgmr.msra.gmra.mrb[8].mxu1 %vm4190_vm2, %v2936_v20  ;;  %vm2991_vm0 = vcmp.eq.s32.totalorder %v4191_v26, %v2652_v51  ;;  %vm2998_vm1 = vcmp.eq.s32.totalorder %v4194_v0, %v2652_v51  ;;  %2225 = vmatpush1.bf16.msra.mxu0 %v4197_v35  ;;  %vm3009_vm2 = vcmp.eq.s32.totalorder %v547_v30, %v2652_v51  ;;  %v4201_v29 = vmov 0 }
 0x112   :  { %v4193_v9 = vsel %vm2991_vm0, 4294967295, %v4192_v9  ;;  %v4196_v27 = vsel %vm2998_vm1, 4294967295, %v4195_v27  ;;  %2235 = vmatpush1.bf16.msra.mxu1 %v4198_v28  ;;  %v4200_v43 = vsel %vm3009_vm2, 4294967295, %v4199_v43  ;;  %vm3014_vm7 = vcmp.eq.s32.totalorder %v498_v33, %v2652_v51  ;;  %2228 = vmatprep.subr.msk.bf16.mxu0 %vm2851_vm8, %v2226_v46 }
 0x113   :  { %v4202_v29 = vsel %vm3014_vm7, 4294967295, %v4201_v29  ;;  %vm3019_vm1 = vcmp.eq.s32.totalorder %v499_v41, %v2652_v51  ;;  %v4203_v5 = vmov 0  ;;  %2238 = vmatprep.subr.msk.bf16.mxu1 %vm2851_vm8, %v2236_v39  ;;  %vm3033_vm7 = vcmp.eq.s32.totalorder %v530_v12, %v2652_v51 }
 0x114   :  { %v4204_v5 = vsel %vm3019_vm1, 4294967295, %v4203_v5  ;;  %v4205_v11 = vmov 0  ;;  %vm3038_vm1 = vcmp.eq.s32.totalorder %v531_v23, %v2652_v51  ;;  %v500_v19 = vand.u32 31, %v436_v13 }
 0x115   :  { %v4206_v11 = vsel %vm3033_vm7, 4294967295, %v4205_v11  ;;  %v4208_v17 = vsel %vm3038_vm1, 4294967295, %v4207_v17  ;;  %v501_v46 = vand.u32 31, %v437_v25  ;;  %v455_v40 = vadd.s32 200, %v2626_v42 }
 0x116   :  { %v4209_v39 = vmov 0.0   ;;  %vm3050_vm7 = vcmp.eq.s32.totalorder %v516_v8, %v2652_v51  ;;  %v4210_v30 = vmov 0  ;;  %vm3055_vm1 = vcmp.eq.s32.totalorder %v517_v48, %v2652_v51 }
 0x117   :  { %1002 = vmatprep.mubr.f32.mxu0 %v4209_v39  ;;  %1073 = vmatprep.mubr.f32.mxu1 %v4209_v39  ;;  %v4211_v30 = vsel %vm3050_vm7, 4294967295, %v4210_v30  ;;  %v4212_v33 = vmov 0  ;;  %v532_v41 = vand.u32 31, %v468_v49  ;;  %v533_v12 = vand.u32 31, %v469_v45 }
 0x118   :  { %v4213_v33 = vsel %vm3055_vm1, 4294967295, %v4212_v33  ;;  %vm3064_vm15 = vcmp.eq.s32.totalorder %v548_v16, %v2652_v51  ;;  %v4214_v23 = vmov 0  ;;  %vm3069_vm2 = vcmp.eq.s32.totalorder %v549_v34, %v2652_v51 }
 0x119   :  { %v4215_v23 = vsel %vm3064_vm15, 4294967295, %v4214_v23  ;;  %v4217_v13 = vmov 0  ;;  %v486_v25 = vadd.s32 448, %v2626_v42  ;;  %v487_v7 = vadd.s32 456, %v2626_v42 }
 0x11a   :  { %4216 = vst [vmem:[#allocation22_spill] sm:$0xff] %v4215_v23  ;;  %v4218_v13 = vsel %vm3069_vm2, 4294967295, %v4217_v13  ;;  %v4220_v8 = vpack.c.bf16 %v2838_v6, %v2802_v54  ;;  %v4221_v48 = vpack.c.bf16 %v2844_v56, %v2806_v55  ;;  %v518_v49 = vand.u32 31, %v454_v10  ;;  %vm4222_vm2 = vmpackc.low %vm2788_vm4, %vm2783_vm3 }
 0x11b   :  { %4219 = vst [vmem:[#allocation23_spill] sm:$0xff] %v4218_v13  ;;  %v438_v45 = vadd.s32 64, %v2626_v42  ;;  %v439_v26 = vadd.s32 72, %v2626_v42  ;;  %v470_v6 = vadd.s32 320, %v2626_v42  ;;  %v4024_v54 = vmov 1.0|1.0  }
 0x11c   :  { %2231 = vmatpush1.bf16.msk.msra.mxu0 %vm2851_vm8, %v4220_v8  ;;  %2241 = vmatpush1.bf16.msk.msra.mxu1 %vm2851_vm8, %v4221_v48  ;;  %vm4223_vm8 = vmpackc.low %vm2830_vm6, %vm2823_vm5  ;;  %vm3109_vm15 = vcmp.eq.s32.totalorder %v500_v19, %v2652_v51  ;;  %v4224_v55 = vmov 0  ;;  %vm3114_vm3 = vcmp.eq.s32.totalorder %v501_v46, %v2652_v51  ;;  %v4227_v56 = vmov 0 }
 0x11d   :  { %2243 = vmatprep.subr.msk.bf16.mxu0 %vm4222_vm2, %v4024_v54  ;;  %2275 = vmatprep.subr.msk.bf16.mxu1 %vm4223_vm8, %v4024_v54  ;;  %v4225_v55 = vsel %vm3109_vm15, 4294967295, %v4224_v55  ;;  %v4228_v56 = vsel %vm3114_vm3, 4294967295, %v4227_v56  ;;  %v519_v57 = vand.u32 31, %v455_v40  ;;  %v471_v0 = vadd.s32 328, %v2626_v42 }
 0x11e   :  { %4226 = vst [vmem:[#allocation24_spill] sm:$0xff] %v4225_v55  ;;  %vm4229_vm2 = vnez %v4171_v50  ;;  %vm4230_vm8 = vnez %v4173_v53  ;;  %vm3124_vm0 = vcmp.eq.s32.totalorder %v532_v41, %v2652_v51  ;;  %v4231_v16 = vmov 0 }
 0x11f   :  { %v4232_v16 = vsel %vm3124_vm0, 4294967295, %v4231_v16  ;;  %vm3129_vm6 = vcmp.eq.s32.totalorder %v533_v12, %v2652_v51  ;;  %v4233_v34 = vmov 0  ;;  %v456_v35 = vadd.s32 208, %v2626_v42 }
 0x120   :  { %v4234_v34 = vsel %vm3129_vm6, 4294967295, %v4233_v34  ;;  %v457_v28 = vadd.s32 216, %v2626_v42  ;;  %vm4235_vm4 = vcmask 244736   ;;  %vm4237_vm5 = vnez %v4175_v21 }
 0x121   :  { %1894 = vmatmul.mubr.msk.f32.vlgmr.msra.gmra.mrb[10].mxu0 %vm4235_vm4, %v2936_v20  ;;  %vm4236_vm3 = vmmov %vm4235_vm4  ;;  %vm4238_vm15 = vnez %v4177_v32  ;;  %v550_v10 = vand.u32 31, %v486_v25  ;;  %v551_v19 = vand.u32 31, %v487_v7  ;;  %v488_v46 = vadd.s32 464, %v2626_v42 }
 0x122   :  { %1897 = vmatmul.mubr.msk.f32.vlgmr.msra.gmra.mrb[10].mxu1 %vm4236_vm3, %v2936_v20  ;;  %v489_v40 = vadd.s32 472, %v2626_v42  ;;  %vm4239_vm4 = vmpackc.low %vm2865_vm10, %vm2858_vm9  ;;  %vm4241_vm0 = vnez %v4182_v52  ;;  %vm4242_vm6 = vnez %v4185_v44  ;;  %vm3162_vm7 = vcmp.eq.s32.totalorder %v518_v49, %v2652_v51 }
 0x123   :  { %2245 = vmatpush3.bf16.msk.msra.mxu0 %vm4239_vm4, %v4024_v54  ;;  %vm4240_vm3 = vmpackc.low %vm2887_vm12, %vm2880_vm11  ;;  %v4243_v20 = vmov 0  ;;  %v502_v41 = vand.u32 31, %v438_v45  ;;  %v503_v12 = vand.u32 31, %v439_v26  ;;  %v534_v25 = vand.u32 31, %v470_v6 }
 0x124   :  { %2277 = vmatpush3.bf16.msk.msra.mxu1 %vm4240_vm3, %v4024_v54  ;;  %v4244_v20 = vsel %vm3162_vm7, 4294967295, %v4243_v20  ;;  %vm4246_vm4 = vmpackc.low %vm2905_vm14, %vm2898_vm13  ;;  %vm4248_vm1 = vnez %v4188_v61  ;;  %vm4249_vm11 = vnez %v4193_v9  ;;  %vm3183_vm9 = vcmp.eq.s32.totalorder %v519_v57, %v2652_v51 }
 0x125   :  { %4245 = vst [vmem:[#allocation25_spill] sm:$0xff] %v4244_v20  ;;  %2247 = vmatprep.subr.msk.bf16.mxu0 %vm4246_vm4, %v4024_v54  ;;  %vm4247_vm3 = vmpackc.low %vm4230_vm8, %vm4229_vm2  ;;  %v4250_v7 = vmov 0  ;;  %v535_v8 = vand.u32 31, %v471_v0  ;;  %v440_v48 = vadd.s32 80, %v2626_v42  ;;  %v441_v49 = vadd.s32 88, %v2626_v42 }
 0x126   :  { %2279 = vmatprep.subr.msk.bf16.mxu1 %vm4247_vm3, %v4024_v54  ;;  %v4251_v7 = vsel %vm3183_vm9, 4294967295, %v4250_v7  ;;  %vm4253_vm4 = vnez %v4196_v27  ;;  %vm4254_vm2 = vnez %v4200_v43  ;;  %v520_v45 = vand.u32 31, %v456_v35  ;;  %vm4264_vm3 = vmpackc.low %vm4238_vm15, %vm4237_vm5 }
 0x127   :  { %4252 = vst [vmem:[#allocation26_spill] sm:$0xff] %v4251_v7  ;;  %v521_v26 = vand.u32 31, %v457_v28  ;;  %v472_v6 = vadd.s32 336, %v2626_v42  ;;  %v473_v54 = vadd.s32 344, %v2626_v42  ;;  %vm4255_vm12 = vnez %v4202_v29  ;;  %2249 = vmatpush3.bf16.msk.msra.mxu0 %vm4264_vm3, %v4263_v15  ;;  %vm4265_vm13 = vmpackc.low %vm4242_vm6, %vm4241_vm0 }
 0x128   :  { %vm4256_vm8 = vnez %v4204_v5  ;;  %vm3200_vm14 = vcmp.eq.s32.totalorder %v550_v10, %v2652_v51  ;;  %v4257_v57 = vmov 0  ;;  %vm3205_vm10 = vcmp.eq.s32.totalorder %v551_v19, %v2652_v51  ;;  %2281 = vmatpush3.bf16.msk.msra.mxu1 %vm4265_vm13, %v4263_v15  ;;  %vm4274_vm13 = vmpackc.low %vm4249_vm11, %vm4248_vm1 }
 0x129   :  { %v4258_v57 = vsel %vm3200_vm14, 4294967295, %v4257_v57  ;;  %v4260_v0 = vmov 0  ;;  %v552_v35 = vand.u32 31, %v488_v46  ;;  %v553_v28 = vand.u32 31, %v489_v40  ;;  %2251 = vmatprep.subr.msk.bf16.mxu0 %vm4274_vm13, %v4263_v15  ;;  %vm4275_vm9 = vmpackc.low %vm4254_vm2, %vm4253_vm4 }
 0x12a   :  { %4259 = vst [vmem:[#allocation27_spill] sm:$0xff] %v4258_v57  ;;  %v4261_v0 = vsel %vm3205_vm10, 4294967295, %v4260_v0  ;;  %vm4266_vm14 = vnez %v4206_v11  ;;  %vm4267_vm10 = vnez %v4208_v17  ;;  %vm3226_vm7 = vcmp.eq.s32.totalorder %v502_v41, %v2652_v51  ;;  %2283 = vmatprep.subr.msk.bf16.mxu1 %vm4275_vm9, %v4263_v15 }
 0x12b   :  { %4262 = vst [vmem:[#allocation28_spill] sm:$0xff] %v4261_v0  ;;  %v4268_v10 = vmov 0  ;;  %vm3231_vm5 = vcmp.eq.s32.totalorder %v503_v12, %v2652_v51  ;;  %v4270_v19 = vmov 0  ;;  %vm3236_vm3 = vcmp.eq.s32.totalorder %v534_v25, %v2652_v51 }
 0x12c   :  { %v4269_v10 = vsel %vm3226_vm7, 4294967295, %v4268_v10  ;;  %v4271_v19 = vsel %vm3231_vm5, 4294967295, %v4270_v19  ;;  %v4272_v46 = vmov 0  ;;  %v458_v40 = vadd.s32 224, %v2626_v42 }
 0x12d   :  { %v4273_v46 = vsel %vm3236_vm3, 4294967295, %v4272_v46  ;;  %vm4276_vm0 = vnez %v4211_v30  ;;  %vm4277_vm6 = vnez %v4213_v33  ;;  %vm3258_vm3 = vcmp.eq.s32.totalorder %v535_v8, %v2652_v51 }
 0x12e   :  { %v4278_v41 = vmov 0  ;;  %v504_v12 = vand.u32 31, %v440_v48  ;;  %v505_v25 = vand.u32 31, %v441_v49  ;;  %vm4280_vm13 = vnez %v4215_v23 }
 0x12f   :  { %v4279_v41 = vsel %vm3258_vm3, 4294967295, %v4278_v41  ;;  %vm4281_vm1 = vnez %v4218_v13  ;;  %vm3268_vm9 = vcmp.eq.s32.totalorder %v520_v45, %v2652_v51  ;;  %v4282_v24 = vmov 0  ;;  %vm4293_vm3 = vmpackc.low %vm4256_vm8, %vm4255_vm12 }
 0x130   :  { %v4283_v24 = vsel %vm3268_vm9, 4294967295, %v4282_v24  ;;  %vm3273_vm15 = vcmp.eq.s32.totalorder %v521_v26, %v2652_v51  ;;  %v4284_v8 = vmov 0  ;;  %v536_v38 = vand.u32 31, %v472_v6  ;;  %2253 = vmatpush3.bf16.msk.msra.mxu0 %vm4293_vm3, %v4263_v15  ;;  %vm4297_vm3 = vmpackc.low %vm4277_vm6, %vm4276_vm0 }
 0x131   :  { %v4285_v8 = vsel %vm3273_vm15, 4294967295, %v4284_v8  ;;  %v537_v48 = vand.u32 31, %v473_v54  ;;  %vm4286_vm2 = vnez %v4225_v55  ;;  %vm4287_vm11 = vnez %v4228_v56  ;;  %2255 = vmatprep.subr.msk.bf16.mxu0 %vm4297_vm3, %v4263_v15 }
 0x132   :  { %vm3282_vm5 = vcmp.eq.s32.totalorder %v552_v35, %v2652_v51  ;;  %v4288_v49 = vmov 0  ;;  %vm3287_vm4 = vcmp.eq.s32.totalorder %v553_v28, %v2652_v51  ;;  %v4291_v45 = vmov 0 }
 0x133   :  { %v4289_v49 = vsel %vm3282_vm5, 4294967295, %v4288_v49  ;;  %v4292_v45 = vsel %vm3287_vm4, 4294967295, %v4291_v45  ;;  %v490_v26 = vadd.s32 480, %v2626_v42  ;;  %v491_v6 = vadd.s32 488, %v2626_v42  ;;  %vm4294_vm5 = vmpackc.low %vm4267_vm10, %vm4266_vm14 }
 0x134   :  { %4290 = vst [vmem:[#allocation29_spill] sm:$0xff] %v4289_v49  ;;  %2285 = vmatpush3.bf16.msk.msra.mxu1 %vm4294_vm5, %v4263_v15  ;;  %vm4295_vm4 = vnez %v4232_v16  ;;  %vm4296_vm15 = vnez %v4234_v34  ;;  %v522_v54 = vand.u32 31, %v458_v40  ;;  %v442_v35 = vadd.s32 96, %v2626_v42  ;;  %vm4298_vm5 = vmpackc.low %vm4281_vm1, %vm4280_vm13 }
 0x135   :  { %v443_v28 = vadd.s32 104, %v2626_v42  ;;  %v474_v14 = vadd.s32 352, %v2626_v42  ;;  %2287 = vmatprep.subr.msk.bf16.mxu1 %vm4298_vm5, %v4263_v15  ;;  %vm4299_vm9 = vnez %v4244_v20  ;;  %vm4300_vm14 = vnez %v4251_v7  ;;  %vm4312_vm13 = vmpackc.low %vm4287_vm11, %vm4286_vm2 }
 0x136   :  { %vm3329_vm12 = vcmp.eq.s32.totalorder %v504_v12, %v2652_v51  ;;  %v4301_v40 = vmov 0  ;;  %vm3334_vm0 = vcmp.eq.s32.totalorder %v505_v25, %v2652_v51  ;;  %v4303_v62 = vmov 0  ;;  %2257 = vmatpush3.bf16.msk.msra.mxu0 %vm4312_vm13, %v4263_v15  ;;  %vm4318_vm13 = vmpackc.low %vm4300_vm14, %vm4299_vm9 }
 0x137   :  { %v4302_v40 = vsel %vm3329_vm12, 4294967295, %v4301_v40  ;;  %v4304_v62 = vsel %vm3334_vm0, 4294967295, %v4303_v62  ;;  %v523_v3 = vand.u32 31, %v459_v63  ;;  %vm4305_vm3 = vnez %v4258_v57  ;;  %2259 = vmatprep.subr.msk.bf16.mxu0 %vm4318_vm13, %v4263_v15 }
 0x138   :  { %vm4306_vm5 = vnez %v4261_v0  ;;  %vm3344_vm10 = vcmp.eq.s32.totalorder %v536_v38, %v2652_v51  ;;  %vm3349_vm1 = vcmp.eq.s32.totalorder %v537_v48, %v2652_v51  ;;  %v4309_v12 = vmov 0 }
 0x139   :  { %v4308_v47 = vsel %vm3344_vm10, 4294967295, %v4307_v47  ;;  %v4310_v12 = vsel %vm3349_vm1, 4294967295, %v4309_v12  ;;  %v460_v25 = vadd.s32 240, %v2626_v42  ;;  %v461_v63 = vadd.s32 248, %v2626_v42  ;;  %vm4313_vm1 = vmpackc.low %vm4296_vm15, %vm4295_vm4 }
 0x13a   :  { %v554_v39 = vand.u32 31, %v490_v26  ;;  %v555_v23 = vand.u32 31, %v491_v6  ;;  %v492_v38 = vadd.s32 496, %v2626_v42  ;;  %v493_v13 = vadd.s32 504, %v2626_v42  ;;  %2289 = vmatpush3.bf16.msk.msra.mxu1 %vm4313_vm1, %v4263_v15  ;;  %vm4319_vm1 = vmpackc.low %vm4306_vm5, %vm4305_vm3 }
 0x13b   :  { %vm4314_vm8 = vnez %v4273_v46  ;;  %vm4315_vm10 = vnez %v4279_v41  ;;  %vm3378_vm6 = vcmp.eq.s32.totalorder %v522_v54, %v2652_v51  ;;  %v4316_v48 = vmov 0  ;;  %2291 = vmatprep.subr.msk.bf16.mxu1 %vm4319_vm1, %v4263_v15 }
 0x13c   :  { %v4317_v48 = vsel %vm3378_vm6, 4294967295, %v4316_v48  ;;  %v506_v26 = vand.u32 31, %v442_v35  ;;  %v507_v6 = vand.u32 31, %v443_v28  ;;  %v538_v55 = vand.u32 31, %v474_v14  ;;  %vm4333_vm15 = vmpackc.low %vm4315_vm10, %vm4314_vm8 }
 0x13d   :  { %vm4320_vm7 = vnez %v4283_v24  ;;  %vm4321_vm4 = vnez %v4285_v8  ;;  %vm3399_vm2 = vcmp.eq.s32.totalorder %v523_v3, %v2652_v51  ;;  %v4322_v14 = vmov 0 }
 0x13e   :  { %v4323_v14 = vsel %vm3399_vm2, 4294967295, %v4322_v14  ;;  %v539_v54 = vand.u32 31, %v475_v2  ;;  %v444_v35 = vadd.s32 112, %v2626_v42  ;;  %v445_v28 = vadd.s32 120, %v2626_v42  ;;  %2293 = vmatpush3.bf16.msk.msra.mxu1 %vm4333_vm15, %v4263_v15 }
 0x13f   :  { %vm4324_vm13 = vnez %v4289_v49  ;;  %vm4325_vm3 = vnez %v4292_v45  ;;  %v524_v57 = vand.u32 31, %v460_v25  ;;  %v525_v0 = vand.u32 31, %v461_v63 }
 0x140   :  { %v476_v20 = vadd.s32 368, %v2626_v42  ;;  %v477_v7 = vadd.s32 376, %v2626_v42  ;;  %vm3416_vm5 = vcmp.eq.s32.totalorder %v554_v39, %v2652_v51  ;;  %v4326_v2 = vmov 0  ;;  %vm4341_vm15 = vmpackc.low %vm4325_vm3, %vm4324_vm13 }
 0x141   :  { %v4327_v2 = vsel %vm3416_vm5, 4294967295, %v4326_v2  ;;  %vm3421_vm9 = vcmp.eq.s32.totalorder %v555_v23, %v2652_v51  ;;  %v4328_v3 = vmov 0  ;;  %v556_v25 = vand.u32 31, %v492_v38  ;;  %2295 = vmatprep.subr.msk.bf16.mxu1 %vm4341_vm15, %v4263_v15 }
 0x142   :  { %v4329_v3 = vsel %vm3421_vm9, 4294967295, %v4328_v3  ;;  %v557_v63 = vand.u32 31, %v493_v13  ;;  %vm4330_vm1 = vnez %v4271_v19  ;;  %vm4331_vm14 = vnez %v4269_v10  ;;  %vm4347_vm15 = vmmov %vm3421_vm9 }
 0x143   :  { %vm4332_vm11 = vmpackc.low %vm4330_vm1, %vm4331_vm14  ;;  %vm4334_vm12 = vnez %v4308_v47  ;;  %vm4335_vm0 = vnez %v4310_v12  ;;  %vm3442_vm5 = vcmp.eq.s32.totalorder %v506_v26, %v2652_v51  ;;  %v4336_v39 = vmov 0 }
 0x144   :  { %2261 = vmatpush3.bf16.msk.msra.mxu0 %vm4332_vm11, %v4263_v15  ;;  %v4337_v39 = vsel %vm3442_vm5, 4294967295, %v4336_v39  ;;  %vm3447_vm14 = vcmp.eq.s32.totalorder %v507_v6, %v2652_v51  ;;  %v4338_v23 = vmov 0  ;;  %vm4340_vm11 = vmpackc.low %vm4321_vm4, %vm4320_vm7  ;;  %vm3468_vm8 = vcmp.eq.s32.totalorder %v538_v55, %v2652_v51 }
 0x145   :  { %v4339_v23 = vsel %vm3447_vm14, 4294967295, %v4338_v23  ;;  %2263 = vmatprep.subr.msk.bf16.mxu0 %vm4340_vm11, %v4263_v15  ;;  %vm3473_vm7 = vcmp.eq.s32.totalorder %v539_v54, %v2652_v51  ;;  %v508_v26 = vand.u32 31, %v444_v35  ;;  %v509_v6 = vand.u32 31, %v445_v28  ;;  %vm4359_vm4 = vmpackc.low %vm4335_vm0, %vm4334_vm12 }
 0x146   :  { %vm4346_vm11 = vnez %v4327_v2  ;;  %vm3482_vm3 = vcmp.eq.s32.totalorder %v524_v57, %v2652_v51  ;;  %v4348_v42 = vmov 0  ;;  %vm3487_vm9 = vcmp.eq.s32.totalorder %v525_v0, %v2652_v51  ;;  %2297 = vmatpush3.bf16.msk.msra.mxu1 %vm4359_vm4, %v4263_v15  ;;  %vm4360_vm14 = vmpackc.low %vm3399_vm2, %vm3378_vm6 }
 0x147   :  { %v4349_v42 = vsel %vm3482_vm3, 4294967295, %v4348_v42  ;;  %v4350_v55 = vmov 0  ;;  %v540_v54 = vand.u32 31, %v476_v20  ;;  %v541_v49 = vand.u32 31, %v477_v7 }
 0x148   :  { %v4351_v55 = vsel %vm3487_vm9, 4294967295, %v4350_v55  ;;  %vm3496_vm10 = vcmp.eq.s32.totalorder %v556_v25, %v2652_v51  ;;  %v4352_v35 = vmov 0  ;;  %vm3501_vm13 = vcmp.eq.s32.totalorder %v557_v63, %v2652_v51 }
 0x149   :  { %v4353_v35 = vsel %vm3496_vm10, 4294967295, %v4352_v35  ;;  %v4354_v57 = vmov 0  ;;  %vm4356_vm1 = vnez %v4304_v62  ;;  %vm4357_vm9 = vnez %v4302_v40 }
 0x14a   :  { %v4355_v57 = vsel %vm3501_vm13, 4294967295, %v4354_v57  ;;  %vm4358_vm3 = vmpackc.low %vm4356_vm1, %vm4357_vm9  ;;  %vm4362_vm4 = vnez %v4349_v42  ;;  %vm4363_vm12 = vnez %v4351_v55  ;;  %vm3538_vm5 = vcmp.eq.s32.totalorder %v508_v26, %v2652_v51  ;;  %v1364_v55 = vld [vmem:[%s3979_s3] sm:$0x1] }
 0x14b   :  { %2265 = vmatpush3.bf16.msk.msra.mxu0 %vm4358_vm3, %v4263_v15  ;;  %vm4361_vm3 = vmpackc.low %vm4347_vm15, %vm4346_vm11  ;;  %v4364_v20 = vmov 0  ;;  %vm3543_vm6 = vcmp.eq.s32.totalorder %v509_v6, %v2652_v51  ;;  %v4366_v7 = vmov 0  ;;  %v4368_v0 = vmov 0 }
 0x14c   :  { %2267 = vmatprep.subr.msk.bf16.mxu0 %vm4360_vm14, %v4263_v15  ;;  %2299 = vmatprep.subr.msk.bf16.mxu1 %vm4361_vm3, %v4263_v15  ;;  %v4365_v20 = vsel %vm3538_vm5, 4294967295, %v4364_v20  ;;  %v4367_v7 = vsel %vm3543_vm6, 4294967295, %v4366_v7  ;;  %vm3552_vm3 = vcmp.eq.s32.totalorder %v540_v54, %v2652_v51  ;;  %vm3557_vm0 = vcmp.eq.s32.totalorder %v541_v49, %v2652_v51  ;;  %vm4375_vm14 = vmpackc.low %vm3473_vm7, %vm3468_vm8 }
 0x14d   :  { %v4369_v0 = vsel %vm3552_vm3, 4294967295, %v4368_v0  ;;  %v4370_v28 = vmov 0  ;;  %vm4372_vm11 = vnez %v4339_v23  ;;  %vm4373_vm15 = vnez %v4337_v39  ;;  %2301 = vmatpush3.bf16.msk.msra.mxu1 %vm4375_vm14, %v4263_v15  ;;  %vm4119_vm9 = vmpackc.low %vm3543_vm6, %vm3538_vm5 }
 0x14e   :  { %v4371_v28 = vsel %vm3557_vm0, 4294967295, %v4370_v28  ;;  %vm4374_vm2 = vmpackc.low %vm4372_vm11, %vm4373_vm15  ;;  %vm4382_vm5 = vnez %v4147_v36  ;;  %vm4393_vm6 = vnez %v4173_v53  ;;  %v4449_v53 = vld [vmem:[#allocation29_spill] sm:$0xff]  ;;  %v4476_v42 = vmov 0.0  }
 0x14f   :  { %2269 = vmatpush3.bf16.msk.msra.mxu0 %vm4374_vm2, %v4263_v15  ;;  %vm4376_vm1 = vmpackc.low %vm4363_vm12, %vm4362_vm4 }
 0x150   :  { %2271 = vmatprep.subr.msk.bf16.mxu0 %vm4376_vm1, %v4263_v15  ;;  %vm4377_vm2 = vmpackc.low %vm3501_vm13, %vm3496_vm10  ;;  %vm4378_vm1 = vnez %v4143_v22  ;;  %vm4381_vm13 = vnez %v4149_v31  ;;  %v4423_v22 = vld [vmem:[#allocation24_spill] sm:$0xff] }
 0x151   :  { %2303 = vmatprep.subr.msk.bf16.mxu1 %vm4377_vm2, %v4263_v15  ;;  %vm4120_vm14 = vmpackc.low %vm3557_vm0, %vm3552_vm3  ;;  %vm4379_vm2 = vnez %v4141_v18  ;;  %vm4391_vm3 = vnez %v4166_v4  ;;  %v4419_v18 = vld [vmem:[#allocation22_spill] sm:$0xff]  ;;  %v4431_v4 = vld [vmem:[#allocation25_spill] sm:$0xff] }
 0x152   :  { %2305 = vmatpush3.bf16.msk.msra.mxu1 %vm4120_vm14, %v4263_v15  ;;  %vm4380_vm10 = vmpackc.low %vm4378_vm1, %vm4379_vm2  ;;  %vm4384_vm14 = vnez %v4157_v59  ;;  %vm4387_vm2 = vnez %v4163_v1  ;;  %v4417_v1 = vld [vmem:[#allocation23_spill] sm:$0xff] }
 0x153   :  { %2273 = vmatpush3.bf16.msk.msra.mxu0 %vm4119_vm9, %v4263_v15  ;;  %vm4383_vm9 = vmpackc.low %vm4381_vm13, %vm4382_vm5  ;;  %vm4390_vm13 = vnez %v4169_v37  ;;  %v4434_v37 = vld [vmem:[#allocation28_spill] sm:$0xff] }
 0x154   :  { %2307 = vmatprep.subr.msk.bf16.mxu0 %vm4380_vm10, %v4263_v15  ;;  %2339 = vmatprep.subr.msk.bf16.mxu1 %vm4383_vm9, %v4263_v15  ;;  %vm4385_vm10 = vnez %v4155_v60  ;;  %vm4388_vm9 = vnez %v4160_v58  ;;  %vm4392_vm0 = vmpackc.low %vm4390_vm13, %vm4391_vm3  ;;  %vm4400_vm3 = vnez %v4182_v52  ;;  %vm4403_vm13 = vnez %v4188_v61  ;;  %v4429_v58 = vld [vmem:[#allocation26_spill] sm:$0xff] }
 0x155   :  { %vm4386_vm1 = vmpackc.low %vm4384_vm14, %vm4385_vm10  ;;  %vm4394_vm14 = vnez %v4171_v50  ;;  %v4436_v50 = vld [vmem:[#allocation27_spill] sm:$0xff]  ;;  %v382_v52 = vand.u32 31, %v2652_v51  ;;  %v4477_v61 = vld [vmem:[#allocation2_spill] sm:$0xff] }
 0x156   :  { %vm4389_vm5 = vmpackc.low %vm4387_vm2, %vm4388_vm9  ;;  %vm4397_vm2 = vnez %v4175_v21 }
 0x157   :  { %vm4395_vm10 = vmpackc.low %vm4393_vm6, %vm4394_vm14  ;;  %vm4402_vm6 = vnez %v4193_v9  ;;  %v4478_v9 = vld [vmem:[#allocation3_spill] sm:$0xff] }
 0x158   :  { %vm4404_vm14 = vmpackc.low %vm4402_vm6, %vm4403_vm13  ;;  %vm4412_vm6 = vnez %v4206_v11 }
 0x1e3   :  { %v834_v49 = vpop.f32.mrb[8].mxu0 }
 0x1e4   :  { %v905_v25 = vpop.f32.mrb[8].mxu1  ;;  %v836_v63 = vpop.f32.mrb[9].mxu0 }
 0x1e5   :  { %v907_v26 = vpop.f32.mrb[9].mxu1  ;;  %1144 = vmatprep.mubr.f32.mxu0 %v836_v63 }
 0x1e6   :  { %1214 = vmatprep.mubr.f32.mxu1 %v907_v26  ;;  %1145 = vmatmul.mubr.f32.vlgmr.msra.gmra.mrb[12].mxu0 %v834_v49 }
 0x1e7   :  { %1215 = vmatmul.mubr.f32.vlgmr.msra.gmra.mrb[12].mxu1 %v905_v25  ;;  %2309 = vmatpush3.bf16.msk.msra.mxu0 %vm4386_vm1, %v4263_v15  ;;  %vm4396_vm1 = vnez %v4177_v32 }
 0x1e8   :  { %2341 = vmatpush3.bf16.msk.msra.mxu1 %vm4389_vm5, %v4263_v15  ;;  %2311 = vmatprep.subr.msk.bf16.mxu0 %vm4392_vm0, %v4263_v15  ;;  %vm4398_vm9 = vmpackc.low %vm4396_vm1, %vm4397_vm2  ;;  %vm4399_vm5 = vnez %v4185_v44  ;;  %vm4406_vm1 = vnez %v4196_v27  ;;  %v4507_v27 = vld [vmem:[#allocation16_spill] sm:$0xff] }
 0x1e9   :  { %2343 = vmatprep.subr.msk.bf16.mxu1 %vm4395_vm10, %v4263_v15  ;;  %vm4401_vm0 = vmpackc.low %vm4399_vm5, %vm4400_vm3  ;;  %vm4405_vm10 = vnez %v4200_v43  ;;  %vm4409_vm5 = vnez %v4202_v29  ;;  %v4483_v43 = vld [vmem:[#allocation6_spill] sm:$0xff]  ;;  %v4484_v29 = vld [vmem:[#allocation7_spill] sm:$0xff] }
 0x1ea   :  { %vm4407_vm2 = vmpackc.low %vm4405_vm10, %vm4406_vm1  ;;  %vm4415_vm10 = vnez %v4211_v30 }
 0x1eb   :  { %2313 = vmatpush3.bf16.msk.msra.mxu0 %vm4398_vm9, %v4263_v15  ;;  %vm4408_vm9 = vnez %v4204_v5  ;;  %v4509_v5 = vld [vmem:[#allocation9_spill] sm:$0xff] }
 0x1ec   :  { %2345 = vmatpush3.bf16.msk.msra.mxu1 %vm4401_vm0, %v4263_v15  ;;  %2315 = vmatprep.subr.msk.bf16.mxu0 %vm4404_vm14, %v4263_v15  ;;  %vm4410_vm3 = vmpackc.low %vm4408_vm9, %vm4409_vm5  ;;  %vm4411_vm0 = vnez %v4208_v17  ;;  %vm4414_vm14 = vnez %v4213_v33  ;;  %vm4420_vm9 = vnez %v4419_v18  ;;  %v4498_v18 = vld [vmem:[#allocation10_spill] sm:$0xff]  ;;  %v4510_v17 = vld [vmem:[#allocation13_spill] sm:$0xff] }
 0x1ed   :  { %2347 = vmatprep.subr.msk.bf16.mxu1 %vm4407_vm2, %v4263_v15  ;;  %vm4413_vm13 = vmpackc.low %vm4411_vm0, %vm4412_vm6  ;;  %vm4418_vm2 = vnez %v4417_v1  ;;  %vm4424_vm0 = vnez %v4423_v22  ;;  %v4511_v33 = vld [vmem:[#allocation17_spill] sm:$0xff] }
 0x1ee   :  { %vm4416_vm1 = vmpackc.low %vm4414_vm14, %vm4415_vm10  ;;  %vm4427_vm14 = vnez %v4232_v16 }
 0x1ef   :  { %2317 = vmatpush3.bf16.msk.msra.mxu0 %vm4410_vm3, %v4263_v15  ;;  %vm4421_vm5 = vmpackc.low %vm4418_vm2, %vm4420_vm9  ;;  %vm4422_vm3 = vnez %v4228_v56  ;;  %vm4432_vm2 = vnez %v4431_v4  ;;  %v4500_v4 = vld [vmem:[#allocation18_spill] sm:$0xff] }
 0x1f0   :  { %2349 = vmatpush3.bf16.msk.msra.mxu1 %vm4413_vm13, %v4263_v15  ;;  %2319 = vmatprep.subr.msk.bf16.mxu0 %vm4416_vm1, %v4263_v15  ;;  %vm4425_vm6 = vmpackc.low %vm4422_vm3, %vm4424_vm0  ;;  %vm4426_vm13 = vnez %v4234_v34  ;;  %vm4430_vm1 = vnez %v4429_v58  ;;  %vm4437_vm3 = vnez %v4436_v50  ;;  %v4501_v50 = vld [vmem:[#allocation5_spill] sm:$0xff] }
 0x1f1   :  { %2351 = vmatprep.subr.msk.bf16.mxu1 %vm4421_vm5, %v4263_v15  ;;  %vm4428_vm10 = vmpackc.low %vm4426_vm13, %vm4427_vm14  ;;  %vm4435_vm5 = vnez %v4434_v37  ;;  %vm4440_vm13 = vnez %v4269_v10 }
 0x1f2   :  { %vm4433_vm9 = vmpackc.low %vm4430_vm1, %vm4432_vm2  ;;  %vm4443_vm1 = vnez %v4273_v46 }
 0x1f3   :  { %2321 = vmatpush3.bf16.msk.msra.mxu0 %vm4425_vm6, %v4263_v15  ;;  %vm4438_vm0 = vmpackc.low %vm4435_vm5, %vm4437_vm3  ;;  %vm4439_vm6 = vnez %v4271_v19  ;;  %vm4446_vm5 = vnez %v4283_v24  ;;  %v380_v24 = vadd.s32 256, %v2652_v51 }
 0x1f4   :  { %v1004_v59 = vpop.f32.mrb[10].mxu0  ;;  %2353 = vmatpush3.bf16.msk.msra.mxu1 %vm4428_vm10, %v4263_v15  ;;  %2323 = vmatprep.subr.msk.bf16.mxu0 %vm4433_vm9, %v4263_v15  ;;  %vm4441_vm14 = vmpackc.low %vm4439_vm6, %vm4440_vm13  ;;  %vm4442_vm10 = vnez %v4279_v41  ;;  %vm4445_vm9 = vnez %v4285_v8  ;;  %vm4450_vm6 = vnez %v4449_v53 }
 0x1f5   :  { %v1075_v60 = vpop.f32.mrb[10].mxu1  ;;  %v1006_v31 = vpop.f32.mrb[11].mxu0  ;;  %2355 = vmatprep.subr.msk.bf16.mxu1 %vm4438_vm0, %v4263_v15  ;;  %vm4444_vm2 = vmpackc.low %vm4442_vm10, %vm4443_vm1  ;;  %vm4448_vm0 = vnez %v4292_v45  ;;  %vm4453_vm10 = vnez %v4302_v40  ;;  %v384_v44 = vand.u32 31, %v380_v24 }
 0x1f6   :  { %v1077_v36 = vpop.f32.mrb[11].mxu1  ;;  %1285 = vmatprep.mubr.f32.mxu0 %v1006_v31  ;;  %vm4447_vm3 = vmpackc.low %vm4445_vm9, %vm4446_vm5  ;;  %vm4456_vm9 = vnez %v4308_v47  ;;  %v379_v47 = vadd.s32 128, %v2652_v51 }
 0x1f7   :  { %1355 = vmatprep.mubr.f32.mxu1 %v1077_v36  ;;  %2325 = vmatpush3.bf16.msk.msra.mxu0 %vm4441_vm14, %v4263_v15  ;;  %vm4451_vm13 = vmpackc.low %vm4448_vm0, %vm4450_vm6  ;;  %vm4452_vm14 = vnez %v4304_v62  ;;  %vm4459_vm0 = vnez %v4317_v48  ;;  %v381_v62 = vadd.s32 384, %v2652_v51  ;;  %v4497_v36 = vld [vmem:[#allocation4_spill] sm:$0xff] }
 0x1f8   :  { %2357 = vmatpush3.bf16.msk.msra.mxu1 %vm4444_vm2, %v4263_v15  ;;  %2327 = vmatprep.subr.msk.bf16.mxu0 %vm4447_vm3, %v4263_v15  ;;  %vm4454_vm1 = vmpackc.low %vm4452_vm14, %vm4453_vm10  ;;  %vm4455_vm2 = vnez %v4310_v12  ;;  %vm4458_vm3 = vnez %v4323_v14  ;;  %vm4462_vm14 = vnez %v4327_v2  ;;  %v383_v21 = vand.u32 31, %v379_v47 }
 0x1f9   :  { %2359 = vmatprep.subr.msk.bf16.mxu1 %vm4451_vm13, %v4263_v15  ;;  %vm4457_vm5 = vmpackc.low %vm4455_vm2, %vm4456_vm9  ;;  %vm4461_vm13 = vnez %v4329_v3  ;;  %v385_v32 = vand.u32 31, %v381_v62  ;;  %v4503_v62 = vld [vmem:[#allocation15_spill] sm:$0xff] }
 0x1fa   :  { %vm4460_vm6 = vmpackc.low %vm4458_vm3, %vm4459_vm0  ;;  %vm4470_vm3 = vnez %v4367_v7  ;;  %vm4473_vm0 = vnez %v4371_v28 }
 0x1fb   :  { %2329 = vmatpush3.bf16.msk.msra.mxu0 %vm4454_vm1, %v4263_v15  ;;  %vm4463_vm10 = vmpackc.low %vm4461_vm13, %vm4462_vm14  ;;  %vm391_vm13 = vcmp.eq.s32.totalorder %v383_v21, %v4478_v9  ;;  %vm389_vm14 = vcmp.eq.s32.totalorder %v385_v32, %v4477_v61 }
 0x1fc   :  { %2361 = vmatpush3.bf16.msk.msra.mxu1 %vm4457_vm5, %v4263_v15  ;;  %2331 = vmatprep.subr.msk.bf16.mxu0 %vm4460_vm6, %v4263_v15  ;;  %vm4464_vm1 = vmpackc.low %vm4372_vm11, %vm4373_vm15  ;;  %vm4467_vm5 = vnez %v4355_v57  ;;  %vm4468_vm11 = vnez %v4353_v35  ;;  %vm387_vm6 = vcmp.eq.s32.totalorder %v383_v21, %v4477_v61 }
 0x1fd   :  { %2363 = vmatprep.subr.msk.bf16.mxu1 %vm4463_vm10, %v4263_v15  ;;  %vm4465_vm2 = vmpackc.low %vm3473_vm7, %vm3468_vm8  ;;  %vm4471_vm7 = vnez %v4365_v20  ;;  %vm393_vm10 = vcmp.eq.s32.totalorder %v385_v32, %v4478_v9  ;;  %v1368_v20 = vld [vmem:[%s3980_s4] sm:$0x1] }
 0x1fe   :  { %vm4466_vm9 = vmpackc.low %vm4363_vm12, %vm4362_vm4  ;;  %vm4474_vm12 = vnez %v4369_v0  ;;  %v1519_v0 = vsub.s32 0, %v4477_v61 }
 0x1ff   :  { %2333 = vmatpush3.bf16.msk.msra.mxu0 %vm4464_vm1, %v4263_v15  ;;  %vm4469_vm15 = vmpackc.low %vm4467_vm5, %vm4468_vm11  ;;  %vm388_vm5 = vcmp.eq.s32.totalorder %v384_v44, %v4477_v61  ;;  %vm392_vm11 = vcmp.eq.s32.totalorder %v384_v44, %v4478_v9 }
 0x200   :  { %2365 = vmatpush3.bf16.msk.msra.mxu1 %vm4465_vm2, %v4263_v15  ;;  %2335 = vmatprep.subr.msk.bf16.mxu0 %vm4466_vm9, %v4263_v15  ;;  %vm4472_vm8 = vmpackc.low %vm4470_vm3, %vm4471_vm7  ;;  %vm386_vm2 = vcmp.eq.s32.totalorder %v382_v52, %v4477_v61  ;;  %vm390_vm9 = vcmp.eq.s32.totalorder %v382_v52, %v4478_v9  ;;  %vm395_vm3 = vcmp.eq.s32.totalorder %v383_v21, %v4483_v43  ;;  %v4506_v61 = vld [vmem:[#allocation12_spill] sm:$0xff] }
 0x201   :  { %2367 = vmatprep.subr.msk.bf16.mxu1 %vm4469_vm15, %v4263_v15  ;;  %vm4475_vm4 = vmpackc.low %vm4473_vm0, %vm4474_vm12  ;;  %vm399_vm7 = vcmp.eq.s32.totalorder %v383_v21, %v4484_v29  ;;  %vm397_vm0 = vcmp.eq.s32.totalorder %v385_v32, %v4483_v43  ;;  %vm401_vm12 = vcmp.eq.s32.totalorder %v385_v32, %v4484_v29  ;;  %v4504_v21 = vld [vmem:[#allocation19_spill] sm:$0xff] }
 0x202   :  { %vm3807_vm1 = vmpackc.low %vm391_vm13, %vm387_vm6  ;;  %vm394_vm6 = vcmp.eq.s32.totalorder %v382_v52, %v4483_v43  ;;  %vm398_vm13 = vcmp.eq.s32.totalorder %v382_v52, %v4484_v29  ;;  %v4505_v52 = vld [vmem:[#allocation8_spill] sm:$0xff] }
 0x203   :  { %2337 = vmatpush3.bf16.msk.msra.mxu0 %vm4472_vm8, %v4263_v15  ;;  %vm3818_vm15 = vmpackc.low %vm393_vm10, %vm389_vm14  ;;  %vm396_vm10 = vcmp.eq.s32.totalorder %v384_v44, %v4483_v43  ;;  %v4508_v43 = vld [vmem:[#allocation20_spill] sm:$0xff] }
 0x204   :  { %2369 = vmatpush3.bf16.msk.msra.mxu1 %vm4475_vm4, %v4263_v15  ;;  %2371 = vmatprep.subr.msk.bf16.mxu0 %vm3807_vm1, %v4263_v15  ;;  %vm3827_vm8 = vmpackc.low %vm390_vm9, %vm386_vm2  ;;  %vm400_vm2 = vcmp.eq.s32.totalorder %v384_v44, %v4484_v29 }
 0x205   :  { %2379 = vmatprep.subr.msk.bf16.mxu1 %vm3818_vm15, %v4263_v15  ;;  %vm3836_vm4 = vmpackc.low %vm392_vm11, %vm388_vm5 }
 0x206   :  { %1286 = vmatmul.mubr.f32.vlgmr.msra.gmra.mrb[14].mxu0 %v1004_v59  ;;  %vm3845_vm14 = vmpackc.low %vm399_vm7, %vm395_vm3 }
 0x207   :  { %1356 = vmatmul.mubr.f32.vlgmr.msra.gmra.mrb[14].mxu1 %v1075_v60  ;;  %1439 = vmatprep.mubr.f32.mxu0 %v4476_v42  ;;  %vm3854_vm9 = vmpackc.low %vm401_vm12, %vm397_vm0 }
 0x208   :  { %1510 = vmatprep.mubr.f32.mxu1 %v4476_v42  ;;  %2373 = vmatpush1.bf16.msk.msra.mxu0 %vm3827_vm8, %v4263_v15  ;;  %vm3861_vm5 = vmpackc.low %vm398_vm13, %vm394_vm6 }
 0x209   :  { %2381 = vmatpush1.bf16.msk.msra.mxu1 %vm3836_vm4, %v4263_v15  ;;  %2375 = vmatprep.subr.msk.bf16.mxu0 %vm3845_vm14, %v4263_v15  ;;  %vm3868_vm11 = vmpackc.low %vm400_vm2, %vm396_vm10 }
 0x20a   :  { %2383 = vmatprep.subr.msk.bf16.mxu1 %vm3854_vm9, %v4263_v15 }
 0x20c   :  { %2377 = vmatpush1.bf16.msk.msra.mxu0 %vm3861_vm5, %v4263_v15 }
 0x20d   :  { %2385 = vmatpush1.bf16.msk.msra.mxu1 %vm3868_vm11, %v4263_v15  ;;  %2387 = vmatprep.subr.msk.bf16.mxu0 %vm3807_vm1, %v4263_v15  ;;  %vm1371_vm1 = vcmask 261120  }
 0x20e   :  { %2395 = vmatprep.subr.msk.bf16.mxu1 %vm3818_vm15, %v4263_v15 }
 0x2b9   :  { %v2094_v16 = vpop.f32.mrb[12].mxu0 }
 0x2ba   :  { %v2129_v34 = vpop.f32.mrb[12].mxu1  ;;  %v2095_v10 = vpop.f32.mrb[13].mxu0 }
 0x2bb   :  { %v2130_v19 = vpop.f32.mrb[13].mxu1  ;;  %v2096_v46 = vadd.f32 %v2095_v10, %v2094_v16  ;;  %v4512_v16 = vld [vmem:[#allocation21_spill] sm:$0xff] }
 0x2bc   :  { %v2131_v41 = vadd.f32 %v2130_v19, %v2129_v34 }
 0x2be   :  { %v1217_v8 = vadd.f32 %v2131_v41, %v2096_v46 }
 0x2c0   :  { %v1220_v14 = vmul.f32 0.0025510204, %v1217_v8 }
 0x2c2   :  { %v1362_v23 = vmul.f32 %v1220_v14, %v1220_v14 }
 0x2d9   :  { %v2164_v45 = vpop.f32.mrb[14].mxu0 }
 0x2da   :  { %v2199_v40 = vpop.f32.mrb[14].mxu1  ;;  %v2165_v12 = vpop.f32.mrb[15].mxu0 }
 0x2db   :  { %v2200_v48 = vpop.f32.mrb[15].mxu1  ;;  %v2166_v2 = vadd.f32 %v2165_v12, %v2164_v45 }
 0x2dc   :  { %v2201_v3 = vadd.f32 %v2200_v48, %v2199_v40 }
 0x2de   :  { %v1358_v39 = vadd.f32 %v2201_v3, %v2166_v2 }
 0x2e0   :  { %v1361_v13 = vmul.f32 0.0025510204, %v1358_v39 }
 0x2e2   :  { %v1363_v38 = vsub.f32 %v1361_v13, %v1362_v23 }
 0x2e4   :  { %v1365_v6 = vadd.f32 0.001, %v1363_v38 }
 0x2e6   :  { %2465 = vrsqrt.f32 %v1365_v6 }
 0x2f0   :  { %v2466_v54 = vpop.eup %2465 }
 0x2f1   :  { %v1367_v35 = vmul.f32 %v2466_v54, %v1364_v55 }
 0x2f3   :  { %2034 = vmatmul.mubr.msk.f32.vlgmr.msra.gmra.mrb[16].mxu0 %vm1371_vm1, %v1367_v35  ;;  %2043 = vmatmul.mubr.msk.f32.vlgmr.msra.gmra.mrb[16].mxu1 %vm1371_vm1, %v1367_v35  ;;  %v1369_v57 = vmul.f32 %v1367_v35, %v1220_v14 }
 0x2f4   :  { %2389 = vmatpush1.bf16.msk.msra.mxu0 %vm3827_vm8, %v4263_v15  ;;  %2397 = vmatpush1.bf16.msk.msra.mxu1 %vm3836_vm4, %v4263_v15 }
 0x2f5   :  { %2391 = vmatprep.subr.msk.bf16.mxu0 %vm3845_vm14, %v4263_v15  ;;  %2399 = vmatprep.subr.msk.bf16.mxu1 %vm3854_vm9, %v4263_v15  ;;  %v1370_v7 = vsub.f32 %v1368_v20, %v1369_v57 }
 0x2f6   :  { %1616 = vmatprep.mubr.f32.mxu0 %v4476_v42  ;;  %1687 = vmatprep.mubr.f32.mxu1 %v4476_v42  ;;  %v4502_v42 = vld [vmem:[#allocation11_spill] sm:$0xff] }
 0x2f8   :  { %2393 = vmatpush1.bf16.msk.msra.mxu0 %vm3861_vm5, %v4263_v15  ;;  %2401 = vmatpush1.bf16.msk.msra.mxu1 %vm3868_vm11, %v4263_v15  ;;  %v4499_v15 = vld [vmem:[#allocation14_spill] sm:$0xff] }
 0x2fb   :  { %2052 = vmatmul.mubr.msk.f32.vlgmr.msra.gmra.mrb[18].mxu0 %vm1371_vm1, %v1370_v7  ;;  %2061 = vmatmul.mubr.msk.f32.vlgmr.msra.gmra.mrb[18].mxu1 %vm1371_vm1, %v1370_v7 }
 0x3c6   :  { %v1441_v28 = vpop.f32.mrb[16].mxu0  ;;  %v1512_v49 = vpop.f32.mrb[16].mxu1 }
 0x3c7   :  { %v1520_v25 = vrot.slane %v1441_v28, %v1519_v0  ;;  %v1528_v63 = vrot.slane %v1512_v49, %v1519_v0  ;;  %v1443_v26 = vpop.f32.mrb[17].mxu0  ;;  %v1514_v59 = vpop.f32.mrb[17].mxu1 }
 0x3c8   :  { %v1524_v60 = vrot.slane %v1443_v26, %v1519_v0  ;;  %v1532_v31 = vrot.slane %v1514_v59, %v1519_v0 }
 0x3c9   :  { %v1533_v1 = vmul.f32 %v1520_v25, %v4497_v36  ;;  %v1537_v22 = vmul.f32 %v1520_v25, %v4498_v18  ;;  %v1541_v58 = vmul.f32 %v1520_v25, %v4499_v15  ;;  %v1545_v37 = vmul.f32 %v1520_v25, %v4500_v4 }
 0x3ca   :  { %v1535_v53 = vmul.f32 %v1528_v63, %v4501_v50  ;;  %v1539_v47 = vmul.f32 %v1528_v63, %v4502_v42  ;;  %v1543_v24 = vmul.f32 %v1528_v63, %v4503_v62  ;;  %v1547_v32 = vmul.f32 %v1528_v63, %v4504_v21 }
 0x3cb   :  { %v1534_v44 = vmul.f32 %v1524_v60, %v4505_v52  ;;  %v1538_v9 = vmul.f32 %v1524_v60, %v4506_v61  ;;  %v1542_v51 = vmul.f32 %v1524_v60, %v4507_v27  ;;  %v1546_v29 = vmul.f32 %v1524_v60, %v4508_v43 }
 0x3cc   :  { %v1536_v11 = vmul.f32 %v1532_v31, %v4509_v5  ;;  %v1540_v30 = vmul.f32 %v1532_v31, %v4510_v17  ;;  %v1544_v56 = vmul.f32 %v1532_v31, %v4511_v33  ;;  %v1548_v34 = vmul.f32 %v1532_v31, %v4512_v16 }
 0x3ce   :  { %v1618_v10 = vpop.f32.mrb[18].mxu0  ;;  %v1689_v19 = vpop.f32.mrb[18].mxu1 }
 0x3cf   :  { %v1697_v46 = vrot.slane %v1618_v10, %v1519_v0  ;;  %v1705_v41 = vrot.slane %v1689_v19, %v1519_v0  ;;  %v1620_v8 = vpop.f32.mrb[19].mxu0  ;;  %v1691_v45 = vpop.f32.mrb[19].mxu1 }
 0x3d0   :  { %v1701_v40 = vrot.slane %v1620_v8, %v1519_v0  ;;  %v1709_v12 = vrot.slane %v1691_v45, %v1519_v0 }
 0x3d1   :  { %v1710_v48 = vadd.f32 %v1697_v46, %v1533_v1  ;;  %v1714_v14 = vadd.f32 %v1697_v46, %v1537_v22  ;;  %v1718_v2 = vadd.f32 %v1697_v46, %v1541_v58  ;;  %v1722_v3 = vadd.f32 %v1697_v46, %v1545_v37 }
 0x3d2   :  { %v1712_v39 = vadd.f32 %v1705_v41, %v1535_v53  ;;  %v1716_v23 = vadd.f32 %v1705_v41, %v1539_v47  ;;  %v1720_v13 = vadd.f32 %v1705_v41, %v1543_v24  ;;  %v1724_v38 = vadd.f32 %v1705_v41, %v1547_v32 }
 0x3d3   :  { %v1726_v6 = vmax.f32 %v1710_v48, 0.0  ;;  %v1730_v55 = vmax.f32 %v1714_v14, 0.0  ;;  %v1734_v54 = vmax.f32 %v1718_v2, 0.0  ;;  %v1738_v35 = vmax.f32 %v1722_v3, 0.0 }
 0x3d4   :  { %v1728_v57 = vmax.f32 %v1712_v39, 0.0  ;;  %v1732_v20 = vmax.f32 %v1716_v23, 0.0  ;;  %v1736_v7 = vmax.f32 %v1720_v13, 0.0  ;;  %v1740_v28 = vmax.f32 %v1724_v38, 0.0 }
 0x3d5   :  { %1742 = vst [vmem:[%s3981_s5] sm:$0xff] %v1726_v6  ;;  %1746 = vst [vmem:[%s3981_s5 + $0x20] sm:$0xff] %v1730_v55  ;;  %v1711_v0 = vadd.f32 %v1701_v40, %v1534_v44  ;;  %v1715_v49 = vadd.f32 %v1701_v40, %v1538_v9  ;;  %v1719_v25 = vadd.f32 %v1701_v40, %v1542_v51 }
 0x3d6   :  { %1750 = vst [vmem:[%s3981_s5 + $0x40] sm:$0xff] %v1734_v54  ;;  %1754 = vst [vmem:[%s3981_s5 + $0x60] sm:$0x3f] %v1738_v35  ;;  %v1723_v63 = vadd.f32 %v1701_v40, %v1546_v29  ;;  %v1713_v26 = vadd.f32 %v1709_v12, %v1536_v11  ;;  %v1717_v59 = vadd.f32 %v1709_v12, %v1540_v30 }
 0x3d7   :  { %1744 = vst [vmem:[%s3981_s5 + $0x10] sm:$0xff] %v1728_v57  ;;  %1748 = vst [vmem:[%s3981_s5 + $0x30] sm:$0xff] %v1732_v20  ;;  %v1721_v60 = vadd.f32 %v1709_v12, %v1544_v56  ;;  %v1725_v31 = vadd.f32 %v1709_v12, %v1548_v34  ;;  %v1727_v36 = vmax.f32 %v1711_v0, 0.0  ;;  %v1731_v1 = vmax.f32 %v1715_v49, 0.0 }
 0x3d8   :  { %1752 = vst [vmem:[%s3981_s5 + $0x50] sm:$0xff] %v1736_v7  ;;  %1756 = vst [vmem:[%s3981_s5 + $0x70] sm:$0x3f] %v1740_v28  ;;  %v1735_v18 = vmax.f32 %v1719_v25, 0.0  ;;  %v1739_v22 = vmax.f32 %v1723_v63, 0.0  ;;  %v1729_v15 = vmax.f32 %v1713_v26, 0.0 }
 0x3d9   :  { %v1733_v58 = vmax.f32 %v1717_v59, 0.0  ;;  %v1737_v4 = vmax.f32 %v1721_v60, 0.0  ;;  %v1741_v37 = vmax.f32 %v1725_v31, 0.0  ;;  %1743 = vst [vmem:[%s3981_s5 + $0x8] sm:$0xff] %v1727_v36  ;;  %1747 = vst [vmem:[%s3981_s5 + $0x28] sm:$0xff] %v1731_v1 }
 0x3da   :  { %1751 = vst [vmem:[%s3981_s5 + $0x48] sm:$0xff] %v1735_v18  ;;  %1755 = vst [vmem:[%s3981_s5 + $0x68] sm:$0x3f] %v1739_v22 }
 0x3db   :  { %1745 = vst [vmem:[%s3981_s5 + $0x18] sm:$0xff] %v1729_v15  ;;  %1749 = vst [vmem:[%s3981_s5 + $0x38] sm:$0xff] %v1733_v58 }
 0x3dc   :  { %1753 = vst [vmem:[%s3981_s5 + $0x58] sm:$0xff] %v1737_v4  ;;  %1757 = vst [vmem:[%s3981_s5 + $0x78] sm:$0x3f] %v1741_v37 }

</bundles_post_ra>
